<compile_context>
chip_gen: v6e
topology: v6e:2x2x1
jax: 0.10.0
libtpu: 0.0.40
codegen_flags: <defaults>
</compile_context>

<pallas_src>
import functools

import jax
import jax.numpy as jnp
from jax import lax
from jax.experimental import pallas as pl
from jax.experimental.pallas import tpu as pltpu

LANE = 128           # vreg lane width; every feature slab is padded to 128 lanes
TM_BASE = 256        # dst-row tile (matches 256-wide MXU on v6e/v7x)


# --------------------------------------------------------------------------------------
# Fused kernel: 3 x (ScaleAgnosticConv + LayerNorm [+ ReLU]), dst-row tiled per layer
# --------------------------------------------------------------------------------------
def _fused_kernel(x_ref, adj_ref,
                  wqkv1, bqkv1, wo1, post1,
                  wqkv2, bqkv2, wo2, post2,
                  wqkv3, bqkv3, wo3, post3,
                  out_ref, h_sc, qkv_sc,
                  *, layer_cfg, tm, compute_dtype):
    cd = compute_dtype
    approx = cd != jnp.float32
    n_pad = adj_ref.shape[0]
    n_tiles = n_pad // tm

    # layer-1 input slab (f32, 128-lane padded)
    h_sc[...] = x_ref[...]

    layer_refs = ((wqkv1, bqkv1, wo1, post1),
                  (wqkv2, bqkv2, wo2, post2),
                  (wqkv3, bqkv3, wo3, post3))

    for li, (wqkv_r, bqkv_r, wo_r, post_r) in enumerate(layer_refs):
        c_att, c_out, apply_relu = layer_cfg[li]
        dst = h_sc if li < 2 else out_ref        # last layer writes lane-dense output

        # Fused q/k/v projection for the whole graph: (N,128) @ (128,384) on the MXU.
        # Lane blocks [0:128]=q (scale folded in), [128:256]=k, [256:384]=v with a
        # ones column at lane c_att (from the bias) -> denominator comes off the MXU.
        h_cd = h_sc[...].astype(cd)
        qkv = jnp.dot(h_cd, wqkv_r[...], preferred_element_type=jnp.float32)
        qkv_sc[...] = (qkv + bqkv_r[...]).astype(cd)

        k_all = qkv_sc[:, LANE:2 * LANE]                 # (N,128) compute_dtype
        v_all = qkv_sc[:, 2 * LANE:3 * LANE]             # (N,128) compute_dtype
        wo = wo_r[...]                                   # (128,128) compute_dtype
        bo = post_r[0:1, :]
        gamma = post_r[1:2, :]
        beta = post_r[2:3, :]
        lane_mask = (lax.broadcasted_iota(jnp.int32, (1, LANE), 1)
                     < c_out).astype(jnp.float32)
        inv_c = 1.0 / float(c_out)

        @pl.loop(0, n_tiles)
        def _(t):                                        # noqa: B023 (traced immediately)
            r0 = pl.multiple_of(t * tm, 8)
            rows = pl.ds(r0, tm)

            # scores[i, j] = scaled(q_i . k_j); bf16 operands, f32 accumulation
            q_t = qkv_sc[rows, 0:LANE]                   # (tm,128) cd, lane-aligned
            s = lax.dot_general(q_t, k_all, (((1,), (1,)), ((), ())),
                                preferred_element_type=jnp.float32)   # (tm, N)

            # weighted row softmax (adj zeroes non-edges; row max is a valid shift)
            m = jnp.max(s, axis=-1, keepdims=True)
            w = adj_ref[rows, :].astype(cd) * jnp.exp((s - m).astype(cd))  # (tm,N) cd

            # [agg | denom] in one MXU matmul (ones column at lane c_att), f32 acc
            ad = jnp.dot(w, v_all, preferred_element_type=jnp.float32)    # (tm,128)
            denom = ad[:, c_att:c_att + 1]
            inv = pl.reciprocal(jnp.maximum(denom, 1e-30), approx=approx)
            agg = (ad * inv).astype(cd)    # wo rows >= c_att are zero -> denom cut off

            # output projection + masked LayerNorm (eps=1e-5) over first c_out lanes
            o = jnp.dot(agg, wo, preferred_element_type=jnp.float32) + bo
            mean = jnp.sum(o, axis=-1, keepdims=True) * inv_c   # padded lanes are 0
            cen = (o - mean) * lane_mask
            var = jnp.sum(cen * cen, axis=-1, keepdims=True) * inv_c
            y = cen * lax.rsqrt(var + 1e-5) * gamma + beta       # padded lanes -> 0
            if apply_relu:
                y = jnp.maximum(y, 0.0)
            dst[rows, :] = y


# --------------------------------------------------------------------------------------
# Parameter packing (lane-aligned, scale folded into q, ones column folded into bv)
# --------------------------------------------------------------------------------------
def _pack_layer(p, compute_dtype):
    in_c = int(p["wq"].shape[1])
    c_att = int(p["wv"].shape[0])        # heads * out_channels (heads = 1)
    c_out = int(p["wo"].shape[0])
    assert in_c <= LANE and c_att < LANE and c_out <= LANE
    scale = 1.0 / (c_att ** 0.5)

    def pad_w(w):                                        # torch (out, in) -> (128, 128)
        return jnp.zeros((LANE, LANE), jnp.float32).at[:w.shape[1], :w.shape[0]].set(w.T)

    def pad_b(b):
        return jnp.zeros((LANE,), jnp.float32).at[:b.shape[0]].set(b)

    wq = pad_w(p["wq"]) * scale                          # attention scale folded into q
    wk = pad_w(p["wk"])
    wv = pad_w(p["wv"])
    wqkv = jnp.concatenate([wq, wk, wv], axis=1).astype(compute_dtype)   # (128, 384)

    bq = pad_b(p["bq"]) * scale
    bk = pad_b(p["bk"])
    bv = pad_b(p["bv"]).at[c_att].set(1.0)               # ones column -> denom via MXU
    bqkv = jnp.concatenate([bq, bk, bv])[None, :]        # (1, 384) f32

    wo = (jnp.zeros((LANE, LANE), jnp.float32)
          .at[:c_att, :c_out].set(p["wo"].T)).astype(compute_dtype)      # (128, 128)
    post = (jnp.zeros((3, LANE), jnp.float32)
            .at[0, :c_out].set(p["bo"])
            .at[1, :c_out].set(p["gamma"])
            .at[2, :c_out].set(p["beta"]))
    return (wqkv, bqkv, wo, post), (c_att, c_out)


# --------------------------------------------------------------------------------------
# Wrapper
# --------------------------------------------------------------------------------------
def local_structure_layer(x, adj_bf16, params, *, compute_dtype=jnp.bfloat16):
    """LocalStructureLayer.forward: conv1->LN->ReLU->conv2->LN->ReLU->conv3->LN.

    x        : (N, F_in) float32 node features
    adj_bf16 : (N, N) bfloat16 dense edge-multiplicity adjacency, adj[i, j] = #edges j->i
    params   : list of 3 per-conv parameter dicts (see make_conv_params)
    """
    n, f_in = x.shape
    cd_bytes = jnp.dtype(compute_dtype).itemsize

    # dst-row tile / padding
    if n <= TM_BASE:
        n_pad = max(8, -(-n // 8) * 8)
        tm = n_pad
    else:
        n_pad = -(-n // TM_BASE) * TM_BASE
        tm = TM_BASE

    x_pad = jnp.zeros((n_pad, LANE), jnp.float32).at[:n, :f_in].set(x)
    adj_pad = jnp.zeros((n_pad, n_pad), jnp.bfloat16).at[:n, :n].set(adj_bf16)

    flat, layer_cfg = [], []
    for li, p in enumerate(params):
        packed, (c_att, c_out) = _pack_layer(p, compute_dtype)
        flat.extend(packed)
        layer_cfg.append((c_att, c_out, li < 2))
    layer_cfg = tuple(layer_cfg)
    c_final = layer_cfg[-1][1]

    kernel = functools.partial(_fused_kernel, layer_cfg=layer_cfg, tm=tm,
                               compute_dtype=compute_dtype)

    # advisory cost estimate
    flops = 0
    for _ in range(3):
        flops += 2 * n_pad * LANE * 3 * LANE       # fused qkv projection
        flops += 2 * n_pad * n_pad * LANE * 2      # scores + [agg|denom] matmuls
        flops += 2 * n_pad * LANE * LANE           # output projection
    weight_bytes = sum(int(a.size) * a.dtype.itemsize for a in flat)
    bytes_accessed = (int(x_pad.size) * 4 + int(adj_pad.size) * 2
                      + weight_bytes + n_pad * LANE * 4)
    cost = pl.CostEstimate(flops=int(flops),
                           transcendentals=int(3 * n_pad * n_pad + 6 * n_pad),
                           bytes_accessed=int(bytes_accessed))

    # generation-aware VMEM budget: physical capacity minus headroom
    try:
        vmem_cap = int(pltpu.get_tpu_info().vmem_capacity_bytes)
    except Exception:
        vmem_cap = 64 << 20                         # conservative (v7x per-core)
    vmem_ceiling = max(vmem_cap - (14 << 20), 24 << 20)
    est = (int(adj_pad.size) * 2                    # bf16 adjacency, resident
           + 3 * n_pad * LANE * 4                   # x slab + out slab + h scratch
           + n_pad * 3 * LANE * cd_bytes            # qkv scratch
           + 2 * tm * n_pad * (4 + 2 * cd_bytes)    # per-tile scores + exp/w temporaries
           + weight_bytes)
    vmem_bytes = int(min(max(2 * est, 16 << 20), vmem_ceiling))

    vmem = pl.BlockSpec(memory_space=pltpu.MemorySpace.VMEM)
    out_full = pl.pallas_call(
        kernel,
        out_shape=jax.ShapeDtypeStruct((n_pad, LANE), jnp.float32),   # lane-dense slab
        in_specs=[vmem] * (2 + len(flat)),
        out_specs=vmem,
        scratch_shapes=[pltpu.VMEM((n_pad, LANE), jnp.float32),       # h (layer io)
                        pltpu.VMEM((n_pad, 3 * LANE), compute_dtype)],  # packed q/k/v
        compiler_params=pltpu.CompilerParams(vmem_limit_bytes=vmem_bytes),
        cost_estimate=cost,
    )(x_pad, adj_pad, *flat)
    return out_full[:n, :c_final]


# --------------------------------------------------------------------------------------
# Deterministic parameter construction (mirrors module __init__ shapes, heads=1)
# --------------------------------------------------------------------------------------
def _xavier(key, fan_out, fan_in):
    limit = (6.0 / (fan_in + fan_out)) ** 0.5
    return jax.random.uniform(key, (fan_out, fan_in), jnp.float32, -limit, limit)


def make_conv_params(key, in_c, out_c):
    ks = jax.random.split(key, 8)
    b_lim = 1.0 / (in_c ** 0.5)
    bo_lim = 1.0 / (out_c ** 0.5)
    return {
        "wq": _xavier(ks[0], out_c, in_c),
        "bq": jax.random.uniform(ks[1], (out_c,), jnp.float32, -b_lim, b_lim),
        "wk": _xavier(ks[2], out_c, in_c),
        "bk": jax.random.uniform(ks[3], (out_c,), jnp.float32, -b_lim, b_lim),
        "wv": _xavier(ks[4], out_c, in_c),
        "bv": jax.random.uniform(ks[5], (out_c,), jnp.float32, -b_lim, b_lim),
        "wo": _xavier(ks[6], out_c, out_c),
        "bo": jax.random.uniform(ks[7], (out_c,), jnp.float32, -bo_lim, bo_lim),
        "gamma": jnp.ones((out_c,), jnp.float32),
        "beta": jnp.zeros((out_c,), jnp.float32),
    }


# --------------------------------------------------------------------------------------
# Pure-JAX sparse reference (PyG MessagePassing semantics) for validation
# --------------------------------------------------------------------------------------
def _sa_conv_ref(x, edge_index, p):
    src, dst = edge_index[0], edge_index[1]
    n = x.shape[0]
    out_c = p["wo"].shape[0]
    q = x @ p["wq"].T + p["bq"]
    k = x @ p["wk"].T + p["bk"]
    v = x @ p["wv"].T + p["bv"]
    alpha = jnp.sum(q[dst] * k[src], axis=-1) / jnp.sqrt(jnp.float32(out_c))
    m = jax.ops.segment_max(alpha, dst, num_segments=n)
    e = jnp.exp(alpha - m[dst])
    denom = jax.ops.segment_sum(e, dst, num_segments=n)
    a = e / jnp.maximum(denom[dst], 1e-30)
    agg = jax.ops.segment_sum(a[:, None] * v[src], dst, num_segments=n)
    return agg @ p["wo"].T + p["bo"]


def _ln_ref(x, gamma, beta):
    mean = jnp.mean(x, axis=-1, keepdims=True)
    var = jnp.mean((x - mean) ** 2, axis=-1, keepdims=True)
    return (x - mean) * lax.rsqrt(var + 1e-5) * gamma + beta


def local_structure_ref(x, edge_index, params):
    x = jnp.maximum(_ln_ref(_sa_conv_ref(x, edge_index, params[0]),
                            params[0]["gamma"], params[0]["beta"]), 0.0)
    x = jnp.maximum(_ln_ref(_sa_conv_ref(x, edge_index, params[1]),
                            params[1]["gamma"], params[1]["beta"]), 0.0)
    x = _ln_ref(_sa_conv_ref(x, edge_index, params[2]),
                params[2]["gamma"], params[2]["beta"])
    return x


# --------------------------------------------------------------------------------------
if __name__ == "__main__":
    key = jax.random.PRNGKey(0)
    N, E = 16, 48
    in_channels, hidden_channels, out_channels = 8, 16, 8

    k_x, k_src, k_dst, k_p1, k_p2, k_p3 = jax.random.split(key, 6)
    x = jax.random.normal(k_x, (N, in_channels), jnp.float32)
    src = jax.random.randint(k_src, (E,), 0, N)
    dst = jax.random.randint(k_dst, (E,), 0, N)
    edge_index = jnp.stack([src, dst], axis=0)              # (2, E)

    # dense multiplicity adjacency in bf16 (exact for edge counts up to 256):
    # adj[i, j] = number of edges j -> i
    adj = jnp.zeros((N, N), jnp.float32).at[dst, src].add(1.0).astype(jnp.bfloat16)

    params = [
        make_conv_params(k_p1, in_channels, hidden_channels),
        make_conv_params(k_p2, hidden_channels, hidden_channels),
        make_conv_params(k_p3, hidden_channels, out_channels),
    ]

    # fast path: bf16 MXU operands, bf16 exp, approx reciprocal
    out_fast = jax.block_until_ready(
        local_structure_layer(x, adj, params, compute_dtype=jnp.bfloat16))
    # precision path: same fused/tiled kernel with f32 operands (tight check)
    out_f32 = jax.block_until_ready(
        local_structure_layer(x, adj, params, compute_dtype=jnp.float32))

    ref = jax.block_until_ready(local_structure_ref(x, edge_index, params))

    assert out_fast.shape == (N, out_channels) and out_f32.shape == (N, out_channels)
    assert jnp.all(jnp.isfinite(out_fast)) and jnp.all(jnp.isfinite(out_f32))
    assert jnp.allclose(out_f32, ref, atol=2e-3, rtol=2e-3), (
        f"f32 path max abs err {jnp.max(jnp.abs(out_f32 - ref))}")
    assert jnp.allclose(out_fast, ref, atol=2e-1, rtol=2e-1), (
        f"bf16 path max abs err {jnp.max(jnp.abs(out_fast - ref))}")
    print("KERNEL_OK")
</pallas_src>

<mosaic_0001>
module attributes {stable_mosaic.version = 11 : i64} {
  func.func @_fused_kernel(%arg0: memref<16x128xf32, #tpu.memory_space<vmem>>, %arg1: memref<16x16xbf16, #tpu.memory_space<vmem>>, %arg2: memref<128x384xbf16, #tpu.memory_space<vmem>>, %arg3: memref<1x384xf32, #tpu.memory_space<vmem>>, %arg4: memref<128x128xbf16, #tpu.memory_space<vmem>>, %arg5: memref<3x128xf32, #tpu.memory_space<vmem>>, %arg6: memref<128x384xbf16, #tpu.memory_space<vmem>>, %arg7: memref<1x384xf32, #tpu.memory_space<vmem>>, %arg8: memref<128x128xbf16, #tpu.memory_space<vmem>>, %arg9: memref<3x128xf32, #tpu.memory_space<vmem>>, %arg10: memref<128x384xbf16, #tpu.memory_space<vmem>>, %arg11: memref<1x384xf32, #tpu.memory_space<vmem>>, %arg12: memref<128x128xbf16, #tpu.memory_space<vmem>>, %arg13: memref<3x128xf32, #tpu.memory_space<vmem>>, %arg14: memref<16x128xf32, #tpu.memory_space<vmem>>, %arg15: memref<16x128xf32, #tpu.memory_space<vmem>>, %arg16: memref<16x384xbf16, #tpu.memory_space<vmem>>) attributes {dimension_semantics = [], scalar_prefetch = 0 : i64, scratch_operands = 2 : i64, tpu.core_type = #tpu.core_type<tc>} {
    %c0 = arith.constant 0 : index
    %c0_0 = arith.constant 0 : index
    %0 = vector.load %arg0[%c0, %c0_0] : memref<16x128xf32, #tpu.memory_space<vmem>>, vector<16x128xf32>
    %c0_1 = arith.constant 0 : index
    %c0_2 = arith.constant 0 : index
    %1 = vector.load %arg15[%c0_1, %c0_2] : memref<16x128xf32, #tpu.memory_space<vmem>>, vector<16x128xf32>
    tpu.vector_store %arg15[%c0_1, %c0_2], %0 {strides = array<i32>} : memref<16x128xf32, #tpu.memory_space<vmem>>, vector<16x128xf32>,
    %c0_3 = arith.constant 0 : index
    %c0_4 = arith.constant 0 : index
    %2 = vector.load %arg15[%c0_3, %c0_4] : memref<16x128xf32, #tpu.memory_space<vmem>>, vector<16x128xf32>
    %3 = arith.truncf %2 : vector<16x128xf32> to vector<16x128xbf16>
    %c0_5 = arith.constant 0 : index
    %c0_6 = arith.constant 0 : index
    %4 = vector.load %arg2[%c0_5, %c0_6] : memref<128x384xbf16, #tpu.memory_space<vmem>>, vector<128x384xbf16>
    %cst = arith.constant dense<0.000000e+00> : vector<16x384xf32>
    %5 = tpu.matmul %3, %4, %cst {dimension_numbers = #tpu.dot_dimension_numbers<[1], [0], [0], [1], [0, 0, 1, 1], [], []>} : vector<16x128xbf16>, vector<128x384xbf16>, vector<16x384xf32> -> vector<16x384xf32>
    %c0_7 = arith.constant 0 : index
    %c0_8 = arith.constant 0 : index
    %6 = vector.load %arg3[%c0_7, %c0_8] : memref<1x384xf32, #tpu.memory_space<vmem>>, vector<1x384xf32>
    %7 = vector.broadcast %6 : vector<1x384xf32> to vector<16x384xf32>
    %8 = arith.addf %5, %7 : vector<16x384xf32>
    %9 = arith.truncf %8 : vector<16x384xf32> to vector<16x384xbf16>
    %c0_9 = arith.constant 0 : index
    %c0_10 = arith.constant 0 : index
    %10 = vector.load %arg16[%c0_9, %c0_10] : memref<16x384xbf16, #tpu.memory_space<vmem>>, vector<16x384xbf16>
    tpu.vector_store %arg16[%c0_9, %c0_10], %9 {strides = array<i32>} : memref<16x384xbf16, #tpu.memory_space<vmem>>, vector<16x384xbf16>,
    %c0_11 = arith.constant 0 : index
    %c128 = arith.constant 128 : index
    %11 = vector.load %arg16[%c0_11, %c128] : memref<16x384xbf16, #tpu.memory_space<vmem>>, vector<16x128xbf16>
    %c0_12 = arith.constant 0 : index
    %c256 = arith.constant 256 : index
    %12 = vector.load %arg16[%c0_12, %c256] : memref<16x384xbf16, #tpu.memory_space<vmem>>, vector<16x128xbf16>
    %c0_13 = arith.constant 0 : index
    %c0_14 = arith.constant 0 : index
    %13 = vector.load %arg4[%c0_13, %c0_14] : memref<128x128xbf16, #tpu.memory_space<vmem>>, vector<128x128xbf16>
    %c0_15 = arith.constant 0 : index
    %c0_16 = arith.constant 0 : index
    %14 = vector.load %arg5[%c0_15, %c0_16] : memref<3x128xf32, #tpu.memory_space<vmem>>, vector<1x128xf32>
    %c1 = arith.constant 1 : index
    %c0_17 = arith.constant 0 : index
    %15 = vector.load %arg5[%c1, %c0_17] : memref<3x128xf32, #tpu.memory_space<vmem>>, vector<1x128xf32>
    %c2 = arith.constant 2 : index
    %c0_18 = arith.constant 0 : index
    %16 = vector.load %arg5[%c2, %c0_18] : memref<3x128xf32, #tpu.memory_space<vmem>>, vector<1x128xf32>
    %17 = tpu.iota {dimensions = array<i32: 1>} : vector<1x128xi32>
    %c16_i32 = arith.constant 16 : i32
    %18 = vector.broadcast %c16_i32 : i32 to vector<1x128xi32>
    %19 = arith.cmpi slt, %17, %18 : vector<1x128xi32>
    %20 = arith.extui %19 : vector<1x128xi1> to vector<1x128xi32>
    %21 = arith.sitofp %20 : vector<1x128xi32> to vector<1x128xf32>
    %c0_i32 = arith.constant 0 : i32
    %c1_i32 = arith.constant 1 : i32
    %22 = arith.muli %c0_i32, %c1_i32 : i32
    %c0_i32_19 = arith.constant 0 : i32
    %23 = arith.addi %c0_i32_19, %22 : i32
    %c16_i32_20 = arith.constant 16 : i32
    %24 = arith.muli %23, %c16_i32_20 : i32
    %25 = tpu.assume_multiple %24, 8 : i32
    %26 = arith.index_cast %25 : i32 to index
    %c0_21 = arith.constant 0 : index
    %27 = vector.load %arg16[%26, %c0_21] : memref<16x384xbf16, #tpu.memory_space<vmem>>, vector<16x128xbf16>
    %cst_22 = arith.constant dense<0.000000e+00> : vector<16x16xf32>
    %28 = tpu.matmul %27, %11, %cst_22 {dimension_numbers = #tpu.dot_dimension_numbers<[1], [1], [0], [0], [0, 0, 1, 0], [], []>} : vector<16x128xbf16>, vector<16x128xbf16>, vector<16x16xf32> -> vector<16x16xf32>
    %cst_23 = arith.constant dense<0xFF800000> : vector<16xf32>
    %29 = vector.multi_reduction <maximumf>, %28, %cst_23 [1] : vector<16x16xf32> to vector<16xf32>
    %30 = vector.shape_cast %29 : vector<16xf32> to vector<16x1xf32>
    %31 = arith.index_cast %25 : i32 to index
    %c0_24 = arith.constant 0 : index
    %32 = vector.load %arg1[%31, %c0_24] : memref<16x16xbf16, #tpu.memory_space<vmem>>, vector<16x16xbf16>
    %33 = vector.broadcast %30 : vector<16x1xf32> to vector<16x16xf32>
    %34 = arith.subf %28, %33 : vector<16x16xf32>
    %35 = arith.truncf %34 : vector<16x16xf32> to vector<16x16xbf16>
    %36 = math.exp %35 : vector<16x16xbf16>
    %37 = arith.mulf %32, %36 : vector<16x16xbf16>
    %cst_25 = arith.constant dense<0.000000e+00> : vector<16x128xf32>
    %38 = tpu.matmul %37, %12, %cst_25 {dimension_numbers = #tpu.dot_dimension_numbers<[1], [0], [0], [1], [0, 0, 1, 1], [], []>} : vector<16x16xbf16>, vector<16x128xbf16>, vector<16x128xf32> -> vector<16x128xf32>
    %39 = vector.extract_strided_slice %38 {offsets = [0, 16], sizes = [16, 1], strides = [1, 1]} : vector<16x128xf32> to vector<16x1xf32>
    %cst_26 = arith.constant 1.000000e-30 : f32
    %40 = vector.broadcast %cst_26 : f32 to vector<16x1xf32>
    %41 = arith.maximumf %39, %40 : vector<16x1xf32>
    %42 = tpu.reciprocal %41 {approx = true} : vector<16x1xf32> -> vector<16x1xf32>
    %43 = vector.broadcast %42 : vector<16x1xf32> to vector<16x128xf32>
    %44 = arith.mulf %38, %43 : vector<16x128xf32>
    %45 = arith.truncf %44 : vector<16x128xf32> to vector<16x128xbf16>
    %cst_27 = arith.constant dense<0.000000e+00> : vector<16x128xf32>
    %46 = tpu.matmul %45, %13, %cst_27 {dimension_numbers = #tpu.dot_dimension_numbers<[1], [0], [0], [1], [0, 0, 1, 1], [], []>} : vector<16x128xbf16>, vector<128x128xbf16>, vector<16x128xf32> -> vector<16x128xf32>
    %47 = vector.broadcast %14 : vector<1x128xf32> to vector<16x128xf32>
    %48 = arith.addf %46, %47 : vector<16x128xf32>
    %cst_28 = arith.constant dense<0.000000e+00> : vector<16xf32>
    %49 = vector.multi_reduction <add>, %48, %cst_28 [1] : vector<16x128xf32> to vector<16xf32>
    %50 = vector.shape_cast %49 : vector<16xf32> to vector<16x1xf32>
    %cst_29 = arith.constant 6.250000e-02 : f32
    %51 = vector.broadcast %cst_29 : f32 to vector<16x1xf32>
    %52 = arith.mulf %50, %51 : vector<16x1xf32>
    %53 = vector.broadcast %52 : vector<16x1xf32> to vector<16x128xf32>
    %54 = arith.subf %48, %53 : vector<16x128xf32>
    %55 = vector.broadcast %21 : vector<1x128xf32> to vector<16x128xf32>
    %56 = arith.mulf %54, %55 : vector<16x128xf32>
    %57 = arith.mulf %56, %56 : vector<16x128xf32>
    %cst_30 = arith.constant dense<0.000000e+00> : vector<16xf32>
    %58 = vector.multi_reduction <add>, %57, %cst_30 [1] : vector<16x128xf32> to vector<16xf32>
    %59 = vector.shape_cast %58 : vector<16xf32> to vector<16x1xf32>
    %cst_31 = arith.constant 6.250000e-02 : f32
    %60 = vector.broadcast %cst_31 : f32 to vector<16x1xf32>
    %61 = arith.mulf %59, %60 : vector<16x1xf32>
    %cst_32 = arith.constant 9.99999974E-6 : f32
    %62 = vector.broadcast %cst_32 : f32 to vector<16x1xf32>
    %63 = arith.addf %61, %62 : vector<16x1xf32>
    %64 = math.rsqrt %63 : vector<16x1xf32>
    %65 = vector.broadcast %64 : vector<16x1xf32> to vector<16x128xf32>
    %66 = arith.mulf %56, %65 : vector<16x128xf32>
    %67 = vector.broadcast %15 : vector<1x128xf32> to vector<16x128xf32>
    %68 = arith.mulf %66, %67 : vector<16x128xf32>
    %69 = vector.broadcast %16 : vector<1x128xf32> to vector<16x128xf32>
    %70 = arith.addf %68, %69 : vector<16x128xf32>
    %cst_33 = arith.constant 0.000000e+00 : f32
    %71 = vector.broadcast %cst_33 : f32 to vector<16x128xf32>
    %72 = arith.maximumf %70, %71 : vector<16x128xf32>
    %73 = arith.index_cast %25 : i32 to index
    %c0_34 = arith.constant 0 : index
    %74 = vector.load %arg15[%73, %c0_34] : memref<16x128xf32, #tpu.memory_space<vmem>>, vector<16x128xf32>
    tpu.vector_store %arg15[%73, %c0_34], %72 {strides = array<i32>} : memref<16x128xf32, #tpu.memory_space<vmem>>, vector<16x128xf32>,
    %c1_i32_35 = arith.constant 1 : i32
    %c0_36 = arith.constant 0 : index
    %c0_37 = arith.constant 0 : index
    %75 = vector.load %arg15[%c0_36, %c0_37] : memref<16x128xf32, #tpu.memory_space<vmem>>, vector<16x128xf32>
    %76 = arith.truncf %75 : vector<16x128xf32> to vector<16x128xbf16>
    %c0_38 = arith.constant 0 : index
    %c0_39 = arith.constant 0 : index
    %77 = vector.load %arg6[%c0_38, %c0_39] : memref<128x384xbf16, #tpu.memory_space<vmem>>, vector<128x384xbf16>
    %cst_40 = arith.constant dense<0.000000e+00> : vector<16x384xf32>
    %78 = tpu.matmul %76, %77, %cst_40 {dimension_numbers = #tpu.dot_dimension_numbers<[1], [0], [0], [1], [0, 0, 1, 1], [], []>} : vector<16x128xbf16>, vector<128x384xbf16>, vector<16x384xf32> -> vector<16x384xf32>
    %c0_41 = arith.constant 0 : index
    %c0_42 = arith.constant 0 : index
    %79 = vector.load %arg7[%c0_41, %c0_42] : memref<1x384xf32, #tpu.memory_space<vmem>>, vector<1x384xf32>
    %80 = vector.broadcast %79 : vector<1x384xf32> to vector<16x384xf32>
    %81 = arith.addf %78, %80 : vector<16x384xf32>
    %82 = arith.truncf %81 : vector<16x384xf32> to vector<16x384xbf16>
    %c0_43 = arith.constant 0 : index
    %c0_44 = arith.constant 0 : index
    %83 = vector.load %arg16[%c0_43, %c0_44] : memref<16x384xbf16, #tpu.memory_space<vmem>>, vector<16x384xbf16>
    tpu.vector_store %arg16[%c0_43, %c0_44], %82 {strides = array<i32>} : memref<16x384xbf16, #tpu.memory_space<vmem>>, vector<16x384xbf16>,
    %c0_45 = arith.constant 0 : index
    %c128_46 = arith.constant 128 : index
    %84 = vector.load %arg16[%c0_45, %c128_46] : memref<16x384xbf16, #tpu.memory_space<vmem>>, vector<16x128xbf16>
    %c0_47 = arith.constant 0 : index
    %c256_48 = arith.constant 256 : index
    %85 = vector.load %arg16[%c0_47, %c256_48] : memref<16x384xbf16, #tpu.memory_space<vmem>>, vector<16x128xbf16>
    %c0_49 = arith.constant 0 : index
    %c0_50 = arith.constant 0 : index
    %86 = vector.load %arg8[%c0_49, %c0_50] : memref<128x128xbf16, #tpu.memory_space<vmem>>, vector<128x128xbf16>
    %c0_51 = arith.constant 0 : index
    %c0_52 = arith.constant 0 : index
    %87 = vector.load %arg9[%c0_51, %c0_52] : memref<3x128xf32, #tpu.memory_space<vmem>>, vector<1x128xf32>
    %c1_53 = arith.constant 1 : index
    %c0_54 = arith.constant 0 : index
    %88 = vector.load %arg9[%c1_53, %c0_54] : memref<3x128xf32, #tpu.memory_space<vmem>>, vector<1x128xf32>
    %c2_55 = arith.constant 2 : index
    %c0_56 = arith.constant 0 : index
    %89 = vector.load %arg9[%c2_55, %c0_56] : memref<3x128xf32, #tpu.memory_space<vmem>>, vector<1x128xf32>
    %90 = tpu.iota {dimensions = array<i32: 1>} : vector<1x128xi32>
    %c16_i32_57 = arith.constant 16 : i32
    %91 = vector.broadcast %c16_i32_57 : i32 to vector<1x128xi32>
    %92 = arith.cmpi slt, %90, %91 : vector<1x128xi32>
    %93 = arith.extui %92 : vector<1x128xi1> to vector<1x128xi32>
    %94 = arith.sitofp %93 : vector<1x128xi32> to vector<1x128xf32>
    %c0_i32_58 = arith.constant 0 : i32
    %c1_i32_59 = arith.constant 1 : i32
    %95 = arith.muli %c0_i32_58, %c1_i32_59 : i32
    %c0_i32_60 = arith.constant 0 : i32
    %96 = arith.addi %c0_i32_60, %95 : i32
    %c16_i32_61 = arith.constant 16 : i32
    %97 = arith.muli %96, %c16_i32_61 : i32
    %98 = tpu.assume_multiple %97, 8 : i32
    %99 = arith.index_cast %98 : i32 to index
    %c0_62 = arith.constant 0 : index
    %100 = vector.load %arg16[%99, %c0_62] : memref<16x384xbf16, #tpu.memory_space<vmem>>, vector<16x128xbf16>
    %cst_63 = arith.constant dense<0.000000e+00> : vector<16x16xf32>
    %101 = tpu.matmul %100, %84, %cst_63 {dimension_numbers = #tpu.dot_dimension_numbers<[1], [1], [0], [0], [0, 0, 1, 0], [], []>} : vector<16x128xbf16>, vector<16x128xbf16>, vector<16x16xf32> -> vector<16x16xf32>
    %cst_64 = arith.constant dense<0xFF800000> : vector<16xf32>
    %102 = vector.multi_reduction <maximumf>, %101, %cst_64 [1] : vector<16x16xf32> to vector<16xf32>
    %103 = vector.shape_cast %102 : vector<16xf32> to vector<16x1xf32>
    %104 = arith.index_cast %98 : i32 to index
    %c0_65 = arith.constant 0 : index
    %105 = vector.load %arg1[%104, %c0_65] : memref<16x16xbf16, #tpu.memory_space<vmem>>, vector<16x16xbf16>
    %106 = vector.broadcast %103 : vector<16x1xf32> to vector<16x16xf32>
    %107 = arith.subf %101, %106 : vector<16x16xf32>
    %108 = arith.truncf %107 : vector<16x16xf32> to vector<16x16xbf16>
    %109 = math.exp %108 : vector<16x16xbf16>
    %110 = arith.mulf %105, %109 : vector<16x16xbf16>
    %cst_66 = arith.constant dense<0.000000e+00> : vector<16x128xf32>
    %111 = tpu.matmul %110, %85, %cst_66 {dimension_numbers = #tpu.dot_dimension_numbers<[1], [0], [0], [1], [0, 0, 1, 1], [], []>} : vector<16x16xbf16>, vector<16x128xbf16>, vector<16x128xf32> -> vector<16x128xf32>
    %112 = vector.extract_strided_slice %111 {offsets = [0, 16], sizes = [16, 1], strides = [1, 1]} : vector<16x128xf32> to vector<16x1xf32>
    %cst_67 = arith.constant 1.000000e-30 : f32
    %113 = vector.broadcast %cst_67 : f32 to vector<16x1xf32>
    %114 = arith.maximumf %112, %113 : vector<16x1xf32>
    %115 = tpu.reciprocal %114 {approx = true} : vector<16x1xf32> -> vector<16x1xf32>
    %116 = vector.broadcast %115 : vector<16x1xf32> to vector<16x128xf32>
    %117 = arith.mulf %111, %116 : vector<16x128xf32>
    %118 = arith.truncf %117 : vector<16x128xf32> to vector<16x128xbf16>
    %cst_68 = arith.constant dense<0.000000e+00> : vector<16x128xf32>
    %119 = tpu.matmul %118, %86, %cst_68 {dimension_numbers = #tpu.dot_dimension_numbers<[1], [0], [0], [1], [0, 0, 1, 1], [], []>} : vector<16x128xbf16>, vector<128x128xbf16>, vector<16x128xf32> -> vector<16x128xf32>
    %120 = vector.broadcast %87 : vector<1x128xf32> to vector<16x128xf32>
    %121 = arith.addf %119, %120 : vector<16x128xf32>
    %cst_69 = arith.constant dense<0.000000e+00> : vector<16xf32>
    %122 = vector.multi_reduction <add>, %121, %cst_69 [1] : vector<16x128xf32> to vector<16xf32>
    %123 = vector.shape_cast %122 : vector<16xf32> to vector<16x1xf32>
    %cst_70 = arith.constant 6.250000e-02 : f32
    %124 = vector.broadcast %cst_70 : f32 to vector<16x1xf32>
    %125 = arith.mulf %123, %124 : vector<16x1xf32>
    %126 = vector.broadcast %125 : vector<16x1xf32> to vector<16x128xf32>
    %127 = arith.subf %121, %126 : vector<16x128xf32>
    %128 = vector.broadcast %94 : vector<1x128xf32> to vector<16x128xf32>
    %129 = arith.mulf %127, %128 : vector<16x128xf32>
    %130 = arith.mulf %129, %129 : vector<16x128xf32>
    %cst_71 = arith.constant dense<0.000000e+00> : vector<16xf32>
    %131 = vector.multi_reduction <add>, %130, %cst_71 [1] : vector<16x128xf32> to vector<16xf32>
    %132 = vector.shape_cast %131 : vector<16xf32> to vector<16x1xf32>
    %cst_72 = arith.constant 6.250000e-02 : f32
    %133 = vector.broadcast %cst_72 : f32 to vector<16x1xf32>
    %134 = arith.mulf %132, %133 : vector<16x1xf32>
    %cst_73 = arith.constant 9.99999974E-6 : f32
    %135 = vector.broadcast %cst_73 : f32 to vector<16x1xf32>
    %136 = arith.addf %134, %135 : vector<16x1xf32>
    %137 = math.rsqrt %136 : vector<16x1xf32>
    %138 = vector.broadcast %137 : vector<16x1xf32> to vector<16x128xf32>
    %139 = arith.mulf %129, %138 : vector<16x128xf32>
    %140 = vector.broadcast %88 : vector<1x128xf32> to vector<16x128xf32>
    %141 = arith.mulf %139, %140 : vector<16x128xf32>
    %142 = vector.broadcast %89 : vector<1x128xf32> to vector<16x128xf32>
    %143 = arith.addf %141, %142 : vector<16x128xf32>
    %cst_74 = arith.constant 0.000000e+00 : f32
    %144 = vector.broadcast %cst_74 : f32 to vector<16x128xf32>
    %145 = arith.maximumf %143, %144 : vector<16x128xf32>
    %146 = arith.index_cast %98 : i32 to index
    %c0_75 = arith.constant 0 : index
    %147 = vector.load %arg15[%146, %c0_75] : memref<16x128xf32, #tpu.memory_space<vmem>>, vector<16x128xf32>
    tpu.vector_store %arg15[%146, %c0_75], %145 {strides = array<i32>} : memref<16x128xf32, #tpu.memory_space<vmem>>, vector<16x128xf32>,
    %c1_i32_76 = arith.constant 1 : i32
    %c0_77 = arith.constant 0 : index
    %c0_78 = arith.constant 0 : index
    %148 = vector.load %arg15[%c0_77, %c0_78] : memref<16x128xf32, #tpu.memory_space<vmem>>, vector<16x128xf32>
    %149 = arith.truncf %148 : vector<16x128xf32> to vector<16x128xbf16>
    %c0_79 = arith.constant 0 : index
    %c0_80 = arith.constant 0 : index
    %150 = vector.load %arg10[%c0_79, %c0_80] : memref<128x384xbf16, #tpu.memory_space<vmem>>, vector<128x384xbf16>
    %cst_81 = arith.constant dense<0.000000e+00> : vector<16x384xf32>
    %151 = tpu.matmul %149, %150, %cst_81 {dimension_numbers = #tpu.dot_dimension_numbers<[1], [0], [0], [1], [0, 0, 1, 1], [], []>} : vector<16x128xbf16>, vector<128x384xbf16>, vector<16x384xf32> -> vector<16x384xf32>
    %c0_82 = arith.constant 0 : index
    %c0_83 = arith.constant 0 : index
    %152 = vector.load %arg11[%c0_82, %c0_83] : memref<1x384xf32, #tpu.memory_space<vmem>>, vector<1x384xf32>
    %153 = vector.broadcast %152 : vector<1x384xf32> to vector<16x384xf32>
    %154 = arith.addf %151, %153 : vector<16x384xf32>
    %155 = arith.truncf %154 : vector<16x384xf32> to vector<16x384xbf16>
    %c0_84 = arith.constant 0 : index
    %c0_85 = arith.constant 0 : index
    %156 = vector.load %arg16[%c0_84, %c0_85] : memref<16x384xbf16, #tpu.memory_space<vmem>>, vector<16x384xbf16>
    tpu.vector_store %arg16[%c0_84, %c0_85], %155 {strides = array<i32>} : memref<16x384xbf16, #tpu.memory_space<vmem>>, vector<16x384xbf16>,
    %c0_86 = arith.constant 0 : index
    %c128_87 = arith.constant 128 : index
    %157 = vector.load %arg16[%c0_86, %c128_87] : memref<16x384xbf16, #tpu.memory_space<vmem>>, vector<16x128xbf16>
    %c0_88 = arith.constant 0 : index
    %c256_89 = arith.constant 256 : index
    %158 = vector.load %arg16[%c0_88, %c256_89] : memref<16x384xbf16, #tpu.memory_space<vmem>>, vector<16x128xbf16>
    %c0_90 = arith.constant 0 : index
    %c0_91 = arith.constant 0 : index
    %159 = vector.load %arg12[%c0_90, %c0_91] : memref<128x128xbf16, #tpu.memory_space<vmem>>, vector<128x128xbf16>
    %c0_92 = arith.constant 0 : index
    %c0_93 = arith.constant 0 : index
    %160 = vector.load %arg13[%c0_92, %c0_93] : memref<3x128xf32, #tpu.memory_space<vmem>>, vector<1x128xf32>
    %c1_94 = arith.constant 1 : index
    %c0_95 = arith.constant 0 : index
    %161 = vector.load %arg13[%c1_94, %c0_95] : memref<3x128xf32, #tpu.memory_space<vmem>>, vector<1x128xf32>
    %c2_96 = arith.constant 2 : index
    %c0_97 = arith.constant 0 : index
    %162 = vector.load %arg13[%c2_96, %c0_97] : memref<3x128xf32, #tpu.memory_space<vmem>>, vector<1x128xf32>
    %163 = tpu.iota {dimensions = array<i32: 1>} : vector<1x128xi32>
    %c8_i32 = arith.constant 8 : i32
    %164 = vector.broadcast %c8_i32 : i32 to vector<1x128xi32>
    %165 = arith.cmpi slt, %163, %164 : vector<1x128xi32>
    %166 = arith.extui %165 : vector<1x128xi1> to vector<1x128xi32>
    %167 = arith.sitofp %166 : vector<1x128xi32> to vector<1x128xf32>
    %c0_i32_98 = arith.constant 0 : i32
    %c1_i32_99 = arith.constant 1 : i32
    %168 = arith.muli %c0_i32_98, %c1_i32_99 : i32
    %c0_i32_100 = arith.constant 0 : i32
    %169 = arith.addi %c0_i32_100, %168 : i32
    %c16_i32_101 = arith.constant 16 : i32
    %170 = arith.muli %169, %c16_i32_101 : i32
    %171 = tpu.assume_multiple %170, 8 : i32
    %172 = arith.index_cast %171 : i32 to index
    %c0_102 = arith.constant 0 : index
    %173 = vector.load %arg16[%172, %c0_102] : memref<16x384xbf16, #tpu.memory_space<vmem>>, vector<16x128xbf16>
    %cst_103 = arith.constant dense<0.000000e+00> : vector<16x16xf32>
    %174 = tpu.matmul %173, %157, %cst_103 {dimension_numbers = #tpu.dot_dimension_numbers<[1], [1], [0], [0], [0, 0, 1, 0], [], []>} : vector<16x128xbf16>, vector<16x128xbf16>, vector<16x16xf32> -> vector<16x16xf32>
    %cst_104 = arith.constant dense<0xFF800000> : vector<16xf32>
    %175 = vector.multi_reduction <maximumf>, %174, %cst_104 [1] : vector<16x16xf32> to vector<16xf32>
    %176 = vector.shape_cast %175 : vector<16xf32> to vector<16x1xf32>
    %177 = arith.index_cast %171 : i32 to index
    %c0_105 = arith.constant 0 : index
    %178 = vector.load %arg1[%177, %c0_105] : memref<16x16xbf16, #tpu.memory_space<vmem>>, vector<16x16xbf16>
    %179 = vector.broadcast %176 : vector<16x1xf32> to vector<16x16xf32>
    %180 = arith.subf %174, %179 : vector<16x16xf32>
    %181 = arith.truncf %180 : vector<16x16xf32> to vector<16x16xbf16>
    %182 = math.exp %181 : vector<16x16xbf16>
    %183 = arith.mulf %178, %182 : vector<16x16xbf16>
    %cst_106 = arith.constant dense<0.000000e+00> : vector<16x128xf32>
    %184 = tpu.matmul %183, %158, %cst_106 {dimension_numbers = #tpu.dot_dimension_numbers<[1], [0], [0], [1], [0, 0, 1, 1], [], []>} : vector<16x16xbf16>, vector<16x128xbf16>, vector<16x128xf32> -> vector<16x128xf32>
    %185 = vector.extract_strided_slice %184 {offsets = [0, 8], sizes = [16, 1], strides = [1, 1]} : vector<16x128xf32> to vector<16x1xf32>
    %cst_107 = arith.constant 1.000000e-30 : f32
    %186 = vector.broadcast %cst_107 : f32 to vector<16x1xf32>
    %187 = arith.maximumf %185, %186 : vector<16x1xf32>
    %188 = tpu.reciprocal %187 {approx = true} : vector<16x1xf32> -> vector<16x1xf32>
    %189 = vector.broadcast %188 : vector<16x1xf32> to vector<16x128xf32>
    %190 = arith.mulf %184, %189 : vector<16x128xf32>
    %191 = arith.truncf %190 : vector<16x128xf32> to vector<16x128xbf16>
    %cst_108 = arith.constant dense<0.000000e+00> : vector<16x128xf32>
    %192 = tpu.matmul %191, %159, %cst_108 {dimension_numbers = #tpu.dot_dimension_numbers<[1], [0], [0], [1], [0, 0, 1, 1], [], []>} : vector<16x128xbf16>, vector<128x128xbf16>, vector<16x128xf32> -> vector<16x128xf32>
    %193 = vector.broadcast %160 : vector<1x128xf32> to vector<16x128xf32>
    %194 = arith.addf %192, %193 : vector<16x128xf32>
    %cst_109 = arith.constant dense<0.000000e+00> : vector<16xf32>
    %195 = vector.multi_reduction <add>, %194, %cst_109 [1] : vector<16x128xf32> to vector<16xf32>
    %196 = vector.shape_cast %195 : vector<16xf32> to vector<16x1xf32>
    %cst_110 = arith.constant 1.250000e-01 : f32
    %197 = vector.broadcast %cst_110 : f32 to vector<16x1xf32>
    %198 = arith.mulf %196, %197 : vector<16x1xf32>
    %199 = vector.broadcast %198 : vector<16x1xf32> to vector<16x128xf32>
    %200 = arith.subf %194, %199 : vector<16x128xf32>
    %201 = vector.broadcast %167 : vector<1x128xf32> to vector<16x128xf32>
    %202 = arith.mulf %200, %201 : vector<16x128xf32>
    %203 = arith.mulf %202, %202 : vector<16x128xf32>
    %cst_111 = arith.constant dense<0.000000e+00> : vector<16xf32>
    %204 = vector.multi_reduction <add>, %203, %cst_111 [1] : vector<16x128xf32> to vector<16xf32>
    %205 = vector.shape_cast %204 : vector<16xf32> to vector<16x1xf32>
    %cst_112 = arith.constant 1.250000e-01 : f32
    %206 = vector.broadcast %cst_112 : f32 to vector<16x1xf32>
    %207 = arith.mulf %205, %206 : vector<16x1xf32>
    %cst_113 = arith.constant 9.99999974E-6 : f32
    %208 = vector.broadcast %cst_113 : f32 to vector<16x1xf32>
    %209 = arith.addf %207, %208 : vector<16x1xf32>
    %210 = math.rsqrt %209 : vector<16x1xf32>
    %211 = vector.broadcast %210 : vector<16x1xf32> to vector<16x128xf32>
    %212 = arith.mulf %202, %211 : vector<16x128xf32>
    %213 = vector.broadcast %161 : vector<1x128xf32> to vector<16x128xf32>
    %214 = arith.mulf %212, %213 : vector<16x128xf32>
    %215 = vector.broadcast %162 : vector<1x128xf32> to vector<16x128xf32>
    %216 = arith.addf %214, %215 : vector<16x128xf32>
    %217 = arith.index_cast %171 : i32 to index
    %c0_114 = arith.constant 0 : index
    %218 = vector.load %arg14[%217, %c0_114] : memref<16x128xf32, #tpu.memory_space<vmem>>, vector<16x128xf32>
    tpu.vector_store %arg14[%217, %c0_114], %216 {strides = array<i32>} : memref<16x128xf32, #tpu.memory_space<vmem>>, vector<16x128xf32>,
    %c1_i32_115 = arith.constant 1 : i32
    return
  }
}

</mosaic_0001>

<bundles_post_ra>
// kernel: tpu_custom_call.1
= control target key start
LH: loop header
LB: loop body
LE: loop exit
PB: predicated region body
PF: predicated region fallthrough
CT: control target
= control target key end

     0   :  { %19 = vsyncpa [#allocation5], 0  ;;  %s3118_s0 = inlined_call_operand.hbm [shape: f32[16,128], index: 0, kind: input, shape index: {}]   ;;  %s3119_s1 = inlined_call_operand.hbm [shape: bf16[16,16], index: 1, kind: input, shape index: {}]   ;;  %s3120_s2 = inlined_call_operand.hbm [shape: bf16[128,384], index: 2, kind: input, shape index: {}]   ;;  %s3121_s3 = inlined_call_operand.hbm [shape: f32[1,384], index: 3, kind: input, shape index: {}]   ;;  %s3122_s4 = inlined_call_operand.hbm [shape: bf16[128,128], index: 4, kind: input, shape index: {}]   ;;  %s3123_s5 = inlined_call_operand.vmem [shape: f32[3,128], index: 5, kind: input, shape index: {}]   ;;  %s3124_s6 = inlined_call_operand.hbm [shape: bf16[128,384], index: 6, kind: input, shape index: {}]   ;;  %s3125_s7 = inlined_call_operand.hbm [shape: f32[1,384], index: 7, kind: input, shape index: {}]   ;;  %s3126_s8 = inlined_call_operand.hbm [shape: bf16[128,128], index: 8, kind: input, shape index: {}]   ;;  %s3127_s9 = inlined_call_operand.vmem [shape: f32[3,128], index: 9, kind: input, shape index: {}]   ;;  %s3128_s10 = inlined_call_operand.hbm [shape: bf16[128,384], index: 10, kind: input, shape index: {}]   ;;  %s3129_s11 = inlined_call_operand.vmem [shape: f32[1,384], index: 11, kind: input, shape index: {}]   ;;  %s3130_s12 = inlined_call_operand.hbm [shape: bf16[128,128], index: 12, kind: input, shape index: {}]   ;;  %s3131_s13 = inlined_call_operand.vmem [shape: f32[3,128], index: 13, kind: input, shape index: {}]   ;;  %s3132_s14 = inlined_call_operand.hbm [shape: f32[16,128], index: 14, kind: output, shape index: {}]  }
   0x1   :  { %20 = vsyncpa [#allocation8], 0 }
   0x2   :  { %21 = vsyncpa [#allocation11], 0 }
   0x3   :  { %22 = vsyncpa [#allocation14], 0 }
   0x4   :  { %23 = vsyncpa [#allocation17], 0 }
   0x5   :  { %24 = vsyncpa [#allocation20], 0 }
   0x6   :  { %25 = vsyncpa [#allocation6], 0  ;;  %s2792_s29 = smov [#allocation7]  }
   0x7   :  { %s43_s30 = sshll.u32 %s2792_s29, 4  ;;  %s44_s30 = int_to_ptr.vmem [resolvable:$true] %s43_s30 }
   0x8   :  { %s2566_s15 = scalar_lea.vmem %s44_s30, 128  ;;  %p2571_p1 = scmp.lt.s32.totalorder %s44_s30, %s44_s30 }
   0x9   :  { %p2567_p0 = scmp.ne.s32.totalorder %s44_s30, %s2566_s15  ;;  %p2572_p2 = scmp.lt.s32.totalorder %s2566_s15, %s2566_s15 }
   0xb   :  { %p2573_p3 = por %p2572_p2, %p2571_p1 }
   0xd   :  { %p2574_p4 = pnand %p2573_p3, %p2567_p0 }
   0xf   :  { %2577 = shalt.err (!%p2574_p4)
}
  0x10   :  { %s2793_s16 = smov 64   ;;  %s2794_s17 = smov 4  }
  0x11   :  { %49 = dma.hbm_to_vmem [thread:$0]  %s3119_s1, 128, %s44_s30, [#allocation8], %s2793_s16, %s2793_s16, %s2794_s17  }
  0x12   :  { %s2795_s20 = smov [#allocation10]  }
  0x13   :  { %s68_s21 = sshll.u32 %s2795_s20, 4  ;;  %s69_s21 = int_to_ptr.vmem [resolvable:$true] %s68_s21 }
  0x14   :  { %s2586_s22 = scalar_lea.vmem %s69_s21, 48  ;;  %s2590_s23 = scalar_lea.vmem %s69_s21, 64 }
  0x15   :  { %p2587_p5 = scmp.ne.s32.totalorder %s69_s21, %s2586_s22  ;;  %p2591_p6 = scmp.lt.s32.totalorder %s69_s21, %s69_s21 }
  0x16   :  { %p2592_p7 = scmp.lt.s32.totalorder %s2590_s23, %s2586_s22 }
  0x18   :  { %p2593_p8 = por %p2592_p7, %p2591_p6 }
  0x1a   :  { %p2594_p9 = pnand %p2593_p8, %p2587_p5 }
  0x1c   :  { %2597 = shalt.err (!%p2594_p9)
}
  0x1d   :  { %71 = dma.hbm_to_vmem [thread:$0]  %s3121_s3, 48, %s69_s21, [#allocation11]  }
  0x1e   :  { %s2796_s26 = smov [#allocation13]   ;;  %s2797_s28 = smov [#allocation16]  }
  0x1f   :  { %s91_s27 = sshll.u32 %s2796_s26, 4  ;;  %s113_s29 = sshll.u32 %s2797_s28, 4  ;;  %s92_s27 = int_to_ptr.vmem [resolvable:$true] %s91_s27  ;;  %s114_s29 = int_to_ptr.vmem [resolvable:$true] %s113_s29 }
  0x20   :  { %s2606_s1 = scalar_lea.vmem %s92_s27, 3072  ;;  %p2611_p11 = scmp.lt.s32.totalorder %s92_s27, %s92_s27 }
  0x21   :  { %p2607_p10 = scmp.ne.s32.totalorder %s92_s27, %s2606_s1  ;;  %p2612_p12 = scmp.lt.s32.totalorder %s2606_s1, %s2606_s1 }
  0x23   :  { %p2613_p13 = por %p2612_p12, %p2611_p11 }
  0x25   :  { %p2614_p0 = pnand %p2613_p13, %p2607_p10 }
  0x27   :  { %2617 = shalt.err (!%p2614_p0)
}
  0x28   :  { %s2798_s30 = smov 192   ;;  %s2799_s15 = smov 12  }
  0x29   :  { %97 = dma.hbm_to_vmem [thread:$0]  %s3124_s6, 3072, %s92_s27, [#allocation14], %s2798_s30, %s2798_s30, %s2799_s15  }
  0x2a   :  { %s2626_s19 = scalar_lea.vmem %s114_s29, 1024  ;;  %p2631_p2 = scmp.lt.s32.totalorder %s114_s29, %s114_s29 }
  0x2b   :  { %p2627_p1 = scmp.ne.s32.totalorder %s114_s29, %s2626_s19  ;;  %p2632_p3 = scmp.lt.s32.totalorder %s2626_s19, %s2626_s19 }
  0x2d   :  { %p2633_p4 = por %p2632_p3, %p2631_p2 }
  0x2f   :  { %p2634_p5 = pnand %p2633_p4, %p2627_p1 }
  0x31   :  { %2637 = shalt.err (!%p2634_p5)
}
  0x32   :  { %119 = dma.hbm_to_vmem [thread:$0]  %s3126_s8, 1024, %s114_s29, [#allocation17], %s2793_s16, %s2793_s16, %s2794_s17  }
  0x33   :  { %s2800_s22 = smov [#allocation4]  }
  0x34   :  { %s31_s23 = sshll.u32 %s2800_s22, 4  ;;  %s32_s23 = int_to_ptr.vmem [resolvable:$true] %s31_s23 }
  0x35   :  { %s2646_s24 = scalar_lea.vmem %s32_s23, 256  ;;  %p2651_p7 = scmp.lt.s32.totalorder %s32_s23, %s32_s23 }
  0x36   :  { %p2647_p6 = scmp.ne.s32.totalorder %s32_s23, %s2646_s24  ;;  %p2652_p8 = scmp.lt.s32.totalorder %s2646_s24, %s2646_s24 }
  0x38   :  { %p2653_p9 = por %p2652_p8, %p2651_p7 }
  0x3a   :  { %p2654_p10 = pnand %p2653_p9, %p2647_p6 }
  0x3c   :  { %2657 = shalt.err (!%p2654_p10)
}
  0x3d   :  { %s2801_s6 = smov 128   ;;  %s2802_s25 = smov 8  }
  0x3e   :  { %37 = dma.hbm_to_vmem [thread:$0]  %s3118_s0, 256, %s32_s23, [#allocation5], %s2801_s6, %s2801_s6, %s2802_s25  }
  0x3f   :  { %s2803_s8 = smov [#allocation9]   ;;  %s2804_s29 = smov [#allocation12]  }
  0x40   :  { %s55_s28 = sshll.u32 %s2803_s8, 4  ;;  %s77_s1 = sshll.u32 %s2804_s29, 4  ;;  %s56_s28 = int_to_ptr.vmem [resolvable:$true] %s55_s28  ;;  %s78_s1 = int_to_ptr.vmem [resolvable:$true] %s77_s1 }
  0x41   :  { %s2666_s18 = scalar_lea.vmem %s56_s28, 3072  ;;  %p2671_p12 = scmp.lt.s32.totalorder %s56_s28, %s56_s28 }
  0x42   :  { %p2667_p11 = scmp.ne.s32.totalorder %s56_s28, %s2666_s18  ;;  %p2672_p13 = scmp.lt.s32.totalorder %s2666_s18, %s2666_s18 }
  0x44   :  { %p2673_p0 = por %p2672_p13, %p2671_p12 }
  0x46   :  { %p2674_p1 = pnand %p2673_p0, %p2667_p11 }
  0x48   :  { %2677 = shalt.err (!%p2674_p1)
}
  0x49   :  { %61 = dma.hbm_to_vmem [thread:$0]  %s3120_s2, 3072, %s56_s28, [#allocation8], %s2798_s30, %s2798_s30, %s2799_s15  }
  0x4a   :  { %s2686_s0 = scalar_lea.vmem %s78_s1, 1024  ;;  %p2691_p3 = scmp.lt.s32.totalorder %s78_s1, %s78_s1 }
  0x4b   :  { %p2687_p2 = scmp.ne.s32.totalorder %s78_s1, %s2686_s0  ;;  %p2692_p4 = scmp.lt.s32.totalorder %s2686_s0, %s2686_s0 }
  0x4d   :  { %p2693_p5 = por %p2692_p4, %p2691_p3 }
  0x4f   :  { %p2694_p6 = pnand %p2693_p5, %p2687_p2 }
  0x51   :  { %2697 = shalt.err (!%p2694_p6)
}
  0x52   :  { %83 = dma.hbm_to_vmem [thread:$0]  %s3122_s4, 1024, %s78_s1, [#allocation11], %s2793_s16, %s2793_s16, %s2794_s17  }
  0x53   :  { %s2805_s22 = smov [#allocation15]   ;;  %s2806_s24 = smov [#allocation18]  }
  0x54   :  { %s104_s23 = sshll.u32 %s2805_s22, 4  ;;  %s127_s2 = sshll.u32 %s2806_s24, 4  ;;  %s105_s23 = int_to_ptr.vmem [resolvable:$true] %s104_s23  ;;  %s128_s2 = int_to_ptr.vmem [resolvable:$true] %s127_s2 }
  0x55   :  { %s2706_s26 = scalar_lea.vmem %s105_s23, 48  ;;  %s2710_s27 = scalar_lea.vmem %s105_s23, 64 }
  0x56   :  { %p2707_p7 = scmp.ne.s32.totalorder %s105_s23, %s2706_s26  ;;  %p2711_p8 = scmp.lt.s32.totalorder %s105_s23, %s105_s23 }
  0x57   :  { %p2712_p9 = scmp.lt.s32.totalorder %s2710_s27, %s2706_s26 }
  0x59   :  { %p2713_p10 = por %p2712_p9, %p2711_p8 }
  0x5b   :  { %p2714_p11 = pnand %p2713_p10, %p2707_p7 }
  0x5d   :  { %2717 = shalt.err (!%p2714_p11)
}
  0x5e   :  { %107 = dma.hbm_to_vmem [thread:$0]  %s3125_s7, 48, %s105_s23, [#allocation14]  }
  0x5f   :  { %s2726_s29 = scalar_lea.vmem %s128_s2, 3072  ;;  %p2731_p13 = scmp.lt.s32.totalorder %s128_s2, %s128_s2 }
  0x60   :  { %p2727_p12 = scmp.ne.s32.totalorder %s128_s2, %s2726_s29  ;;  %p2732_p0 = scmp.lt.s32.totalorder %s2726_s29, %s2726_s29 }
  0x62   :  { %p2733_p1 = por %p2732_p0, %p2731_p13 }
  0x64   :  { %p2734_p2 = pnand %p2733_p1, %p2727_p12 }
  0x66   :  { %2737 = shalt.err (!%p2734_p2)
}
  0x67   :  { %133 = dma.hbm_to_vmem [thread:$0]  %s3128_s10, 3072, %s128_s2, [#allocation17], %s2798_s30, %s2798_s30, %s2799_s15  }
  0x68   :  { %s2807_s18 = smov [#allocation19]  }
  0x69   :  { %s141_s3 = sshll.u32 %s2807_s18, 4  ;;  %s142_s3 = int_to_ptr.vmem [resolvable:$true] %s141_s3 }
  0x6a   :  { %s2746_s19 = scalar_lea.vmem %s142_s3, 1024  ;;  %p2751_p4 = scmp.lt.s32.totalorder %s142_s3, %s142_s3 }
  0x6b   :  { %p2747_p3 = scmp.ne.s32.totalorder %s142_s3, %s2746_s19  ;;  %p2752_p5 = scmp.lt.s32.totalorder %s2746_s19, %s2746_s19 }
  0x6d   :  { %p2753_p6 = por %p2752_p5, %p2751_p4 }
  0x6f   :  { %p2754_p7 = pnand %p2753_p6, %p2747_p3 }
  0x71   :  { %2757 = shalt.err (!%p2754_p7)
}
  0x72   :  { %147 = dma.hbm_to_vmem [thread:$0]  %s3130_s12, 1024, %s142_s3, [#allocation20], %s2793_s16, %s2793_s16, %s2794_s17  }
  0x73   :  { %2778 = dma.done.wait [#allocation5], 256  }
  0x74   :  { %2779 = vsyncadd [#allocation5], 4294967040 }
  0x75   :  { %2780 = dma.done.wait [#allocation8], 3200  }
  0x76   :  { %2781 = vsyncadd [#allocation8], 4294964096 }
  0x77   :  { %2782 = dma.done.wait [#allocation11], 1072  }
  0x78   :  { %2783 = vsyncadd [#allocation11], 4294966224 }
  0x79   :  { %2784 = dma.done.wait [#allocation14], 3120  }
  0x7a   :  { %2785 = vsyncadd [#allocation14], 4294964176 }
  0x7b   :  { %2786 = dma.done.wait [#allocation17], 4096  }
  0x7c   :  { %2787 = vsyncadd [#allocation17], 4294963200 }
  0x7d   :  { %2788 = dma.done.wait [#allocation20], 1024  }
  0x7e   :  { %2789 = vsyncadd [#allocation20], 4294966272  ;;  %v2808_v0 = vmov 0   ;;  %v2809_v1 = vmov 0.0   ;;  %v2399_v2 = vld [vmem:[#allocation9 + $0xac] ss:$12 sps:$4 sm:$0xff]   ;;  %v222_v29 = vlaneseq }
  0x7f   :  { %397 = vmatprep.mubr.bf16.mxu0 %v2808_v0  ;;  %2217 = vmatprep.subr.bf16.mxu1 %v2809_v1  ;;  %v2401_v3 = vld [vmem:[#allocation9 + $0xa8] ss:$12 sps:$4 sm:$0xff]   ;;  %v2404_v5 = vld [vmem:[#allocation9 + $0x90] ss:$12 sps:$4 sm:$0xff]   ;;  %v2407_v7 = vld [vmem:[#allocation9 + $0x78] ss:$12 sps:$4 sm:$0xff]  }
  0x80   :  { %365 = vmatprep.subr.bf16.mxu0 %v2399_v2  ;;  %v2402_v4 = vld [vmem:[#allocation9 + $0x94] ss:$12 sps:$4 sm:$0xff]   ;;  %v2405_v6 = vld [vmem:[#allocation9 + $0x7c] ss:$12 sps:$4 sm:$0xff]   ;;  %v2408_v8 = vld [vmem:[#allocation9 + $0x64] ss:$12 sps:$4 sm:$0xff]  }
  0x81   :  { %366 = vmatpush1.bf16.msra.mxu0 %v2401_v3  ;;  %v2410_v9 = vld [vmem:[#allocation9 + $0x60] ss:$12 sps:$4 sm:$0xff]   ;;  %v2423_v11 = vld [vmem:[#allocation9 + $0xb0] ss:$12 sps:$4 sm:$0xff]   ;;  %v2424_v12 = vld [vmem:[#allocation9 + $0x98] ss:$12 sps:$4 sm:$0xff]  }
  0x82   :  { %367 = vmatprep.subr.bf16.mxu0 %v2402_v4  ;;  %v2411_v10 = vld [vmem:[#allocation9 + $0x4c] ss:$12 sps:$4 sm:$0xff]   ;;  %2218 = vmatpush3.bf16.msra.mxu1 %v2423_v11  ;;  %v2413_v13 = vld [vmem:[#allocation9 + $0x48] ss:$12 sps:$4 sm:$0xff]   ;;  %v2416_v16 = vld [vmem:[#allocation9 + $0x30] ss:$12 sps:$4 sm:$0xff]  }
  0x83   :  { %2219 = vmatprep.subr.bf16.mxu1 %v2809_v1  ;;  %v2414_v14 = vld [vmem:[#allocation9 + $0x34] ss:$12 sps:$4 sm:$0xff]   ;;  %v2417_v17 = vld [vmem:[#allocation9 + $0x1c] ss:$12 sps:$4 sm:$0xff]   ;;  %v2419_v19 = vld [vmem:[#allocation9 + $0x18] ss:$12 sps:$4 sm:$0xff]  }
  0x84   :  { %v2425_v15 = vld [vmem:[#allocation9 + $0x80] ss:$12 sps:$4 sm:$0xff]   ;;  %v2426_v18 = vld [vmem:[#allocation9 + $0x68] ss:$12 sps:$4 sm:$0xff]   ;;  %v2420_v20 = vld [vmem:[#allocation9 + $0x4] ss:$12 sps:$4 sm:$0xff]  }
  0x85   :  { %368 = vmatpush1.bf16.msra.mxu0 %v2404_v5  ;;  %v2427_v21 = vld [vmem:[#allocation9 + $0x50] ss:$12 sps:$4 sm:$0xff]   ;;  %v2422_v22 = vld [vmem:[#allocation9] ss:$12 sps:$4 sm:$0xff]   ;;  %v2428_v26 = vld [vmem:[#allocation9 + $0x38] ss:$12 sps:$4 sm:$0xff]  }
  0x86   :  { %369 = vmatprep.subr.bf16.mxu0 %v2405_v6  ;;  %2220 = vmatpush3.bf16.msra.mxu1 %v2424_v12  ;;  %v181_v23 = vld [vmem:[#allocation4] sm:$0xff]  ;;  %v182_v24 = vld [vmem:[#allocation4 + $0x8] sm:$0xff]  ;;  %vm2810_vm0 = vmmov 0   ;;  %v223_v30 = vshrl.u32 %v222_v29, 7  ;;  %v220_v33 = vld [vmem:[#allocation10] sm:$0x7] }
  0x87   :  { %2221 = vmatprep.subr.bf16.mxu1 %v2809_v1  ;;  %v187_v25 = vpack.c.bf16 %v182_v24, %v181_v23  ;;  %v2429_v27 = vld [vmem:[#allocation9 + $0x20] ss:$12 sps:$4 sm:$0xff]   ;;  %v2430_v28 = vld [vmem:[#allocation9 + $0x8] ss:$12 sps:$4 sm:$0xff]   ;;  %2233 = vmatprep.mubr.msk.bf16.mxu1 %vm2810_vm0, %v2809_v1  ;;  %vm559_vm1 = vcmask 130048   ;;  %s2813_s4 = smov [#allocation21]  }
  0x88   :  { %v2961_v31 = vsub.s32 0, %v223_v30  ;;  %v2963_v32 = vsub.s32 1, %v223_v30  ;;  %v2970_v48 = vsub.s32 2, %v223_v30  ;;  %v567_v11 = vld [vmem:[#allocation7 + $0x4] sm:$0xf]  ;;  %v2439_v23 = vld [vmem:[#allocation12 + $0x10] sm:$0xff]  }
  0x89   :  { %370 = vmatpush1.bf16.msra.mxu0 %v2407_v7  ;;  %s1982_s1 = sshll.u32 %s2813_s4, 4  ;;  %s1983_s1 = int_to_ptr.vmem [resolvable:$true] %s1982_s1 }
  0x8a   :  { %371 = vmatprep.subr.bf16.mxu0 %v2408_v8  ;;  %2222 = vmatpush3.bf16.msra.mxu1 %v2425_v15  ;;  %v225_v34 = vrot.slane %v220_v33, %v2961_v31  ;;  %v229_v35 = vrot.slane %v220_v33, %v2963_v32  ;;  %v233_v49 = vrot.slane %v220_v33, %v2970_v48  ;;  %v2440_v33 = vld [vmem:[#allocation12 + $0x8] sm:$0xff]   ;;  %s2758_s18 = scalar_lea.vmem %s1983_s1, 256  ;;  %p2763_p9 = scmp.lt.s32.totalorder %s1983_s1, %s1983_s1 }
  0x8b   :  { %2223 = vmatprep.subr.bf16.mxu1 %v2809_v1  ;;  %p2759_p8 = scmp.ne.s32.totalorder %s1983_s1, %s2758_s18  ;;  %p2764_p10 = scmp.lt.s32.totalorder %s2758_s18, %s2758_s18 }
  0x8d   :  { %372 = vmatpush1.bf16.msra.mxu0 %v2410_v9  ;;  %p2765_p11 = por %p2764_p10, %p2763_p9 }
  0x8e   :  { %373 = vmatprep.subr.bf16.mxu0 %v2411_v10  ;;  %2224 = vmatpush3.bf16.msra.mxu1 %v2426_v18  ;;  %v566_v10 = vld [vmem:[#allocation7] sm:$0xf]  ;;  %v2434_v18 = vld [vmem:[#allocation12 + $0x38] sm:$0xff]  }
  0x8f   :  { %2225 = vmatprep.subr.bf16.mxu1 %v2809_v1  ;;  %p2766_p12 = pnand %p2765_p11, %p2759_p8 }
  0x91   :  { %374 = vmatpush1.bf16.msra.mxu0 %v2413_v13 }
  0x92   :  { %375 = vmatprep.subr.bf16.mxu0 %v2414_v14  ;;  %2226 = vmatpush3.bf16.msra.mxu1 %v2427_v21  ;;  %v2437_v21 = vld [vmem:[#allocation12 + $0x20] sm:$0xff]  }
  0x93   :  { %2227 = vmatprep.subr.bf16.mxu1 %v2809_v1 }
  0x95   :  { %376 = vmatpush1.bf16.msra.mxu0 %v2416_v16 }
  0x96   :  { %377 = vmatprep.subr.bf16.mxu0 %v2417_v17  ;;  %2228 = vmatpush3.bf16.msra.mxu1 %v2428_v26  ;;  %v2811_v17 = vmov 16  }
  0x97   :  { %2229 = vmatprep.subr.bf16.mxu1 %v2809_v1  ;;  %2395 = vset.pattern.permute.xlu1 %v2811_v17 }
  0x98   :  { %2396 = vset.pattern.permute.xlu0 %v2811_v17  ;;  %v2468_v17 = vld [vmem:[#allocation13 + $0x1c] ss:$12 sps:$4 sm:$0xff]  }
  0x99   :  { %378 = vmatpush1.bf16.msra.mxu0 %v2419_v19  ;;  %v2435_v19 = vld [vmem:[#allocation12 + $0x30] sm:$0xff]  }
  0x9a   :  { %379 = vmatprep.subr.bf16.mxu0 %v2420_v20  ;;  %2230 = vmatpush3.bf16.msra.mxu1 %v2429_v27  ;;  %v2436_v20 = vld [vmem:[#allocation12 + $0x28] sm:$0xff]  }
  0x9b   :  { %2231 = vmatprep.subr.bf16.mxu1 %v2809_v1 }
  0x9d   :  { %380 = vmatpush1.bf16.msra.mxu0 %v2422_v22  ;;  %v2438_v22 = vld [vmem:[#allocation12 + $0x18] sm:$0xff]  }
  0x9e   :  { %2249 = vmatprep.subr.bf16.mxu0 %v2809_v1  ;;  %2232 = vmatpush3.bf16.msra.mxu1 %v2430_v28 }
  0x9f   :  { %2237 = vmatprep.subr.bf16.mxu1 %v2809_v1 }
  0xa0   :  { %398 = vmatmul.mubr.bf16.vlgmr.msra.gmra.mxu0 %v187_v25 }
  0xa1   :  { %2265 = vmatprep.mubr.msk.bf16.mxu0 %vm2810_vm0, %v2809_v1  ;;  %2234 = vmatmul.mubr.bf16.vlgmr.msra.gmra.mxu1 %v187_v25 }
  0xa2   :  { %2239 = vmatprep.mubr.msk.bf16.mxu1 %vm2810_vm0, %v2809_v1  ;;  %2250 = vmatpush3.bf16.msra.mxu0 %v2434_v18  ;;  %v2466_v18 = vld [vmem:[#allocation13 + $0x18] ss:$12 sps:$4 sm:$0xff]  }
  0xa3   :  { %2251 = vmatprep.subr.bf16.mxu0 %v2809_v1 }
  0xa6   :  { %2252 = vmatpush3.bf16.msra.mxu0 %v2435_v19  ;;  %v2469_v19 = vld [vmem:[#allocation13 + $0x20] ss:$12 sps:$4 sm:$0xff]  }
  0xa7   :  { %2253 = vmatprep.subr.bf16.mxu0 %v2809_v1 }
  0xaa   :  { %2254 = vmatpush3.bf16.msra.mxu0 %v2436_v20  ;;  %v2472_v20 = vld [vmem:[#allocation13 + $0x4] ss:$12 sps:$4 sm:$0xff]  }
  0xab   :  { %2255 = vmatprep.subr.bf16.mxu0 %v2809_v1 }
  0xae   :  { %2256 = vmatpush3.bf16.msra.mxu0 %v2437_v21  ;;  %v2470_v21 = vld [vmem:[#allocation13] ss:$12 sps:$4 sm:$0xff]  }
  0xaf   :  { %2257 = vmatprep.subr.bf16.mxu0 %v2809_v1 }
  0xb2   :  { %2258 = vmatpush3.bf16.msra.mxu0 %v2438_v22  ;;  %v2473_v22 = vld [vmem:[#allocation13 + $0x8] ss:$12 sps:$4 sm:$0xff]  }
  0xb3   :  { %2259 = vmatprep.subr.bf16.mxu0 %v2809_v1 }
  0xb6   :  { %2260 = vmatpush3.bf16.msra.mxu0 %v2439_v23 }
  0xb7   :  { %2261 = vmatprep.subr.bf16.mxu0 %v2809_v1 }
  0xba   :  { %2262 = vmatpush3.bf16.msra.mxu0 %v2440_v33  ;;  %v2044_v33 = vld [vmem:[%s3123_s5 + $0x1] ss:$0 sm:$0xff] }
  0xbb   :  { %2263 = vmatprep.subr.bf16.mxu0 %v2809_v1 }
 0x160   :  { %v399_v36 = vpop.f32.mrf.mxu0 }
 0x161   :  { %v400_v38 = vadd.f32 %v399_v36, %v225_v34  ;;  %v442_v50 = vpop.f32.mrf.mxu1 }
 0x162   :  { %v401_v37 = vpop.f32.mrf.mxu0  ;;  %v443_v51 = vadd.f32 %v442_v50, %v233_v49  ;;  %v2991_v50 = vand.u32 127, %v222_v29 }
 0x163   :  { %v402_v39 = vadd.f32 %v401_v37, %v229_v35  ;;  %v2235_v52 = vpop.f32.mrf.mxu1 }
 0x164   :  { %v403_v40 = vpop.f32.mrf.mxu0  ;;  %v2140_v53 = vpack.c.bf16 %v443_v51, %v443_v51  ;;  %vm498_vm2 = vcmp.lt.s32.totalorder %v2991_v50, 16  ;;  %vm1693_vm3 = vcmp.lt.s32.totalorder %v2991_v50, 8 }
 0x165   :  { %v2139_v41 = vpack.c.bf16 %v402_v39, %v400_v38  ;;  %v404_v43 = vadd.f32 %v403_v40, %v225_v34  ;;  %v445_v54 = vpop.f32.mrf.mxu1 }
 0x166   :  { %v405_v42 = vpop.f32.mrf.mxu0  ;;  %470 = vst [vmem:[#allocation3 + $0x8] sm:$0xf] %v2140_v53  ;;  %v446_v55 = vadd.f32 %v445_v54, %v233_v49  ;;  %v2995_v53 = vsel %vm498_vm2, 1.0, %v2809_v1 }
 0x167   :  { %469 = vst [vmem:[#allocation3] sm:$0xff] %v2139_v41  ;;  %v406_v44 = vadd.f32 %v405_v42, %v229_v35  ;;  %v2236_v56 = vpop.f32.mrf.mxu1  ;;  %v2441_v35 = vld [vmem:[#allocation12] sm:$0xff]   ;;  %v2035_v42 = vld [vmem:[%s3123_s5] ss:$0 sm:$0xff] }
 0x168   :  { %v2142_v57 = vpack.c.bf16 %v446_v55, %v446_v55  ;;  %2264 = vmatpush3.bf16.msra.mxu0 %v2441_v35 }
 0x169   :  { %v2141_v45 = vpack.c.bf16 %v406_v44, %v404_v43  ;;  %2269 = vmatprep.subr.bf16.mxu0 %v2809_v1 }
 0x16a   :  { %472 = vst [vmem:[#allocation3 + $0x14] sm:$0xf] %v2142_v57 }
 0x16b   :  { %471 = vst [vmem:[#allocation3 + $0xc] sm:$0xff] %v2141_v45 }
 0x171   :  { %v2433_v58 = vld [vmem:[#allocation3 + $0x8] ss:$12 sps:$4 sm:$0xff]  }
 0x172   :  { %v2431_v46 = vld [vmem:[#allocation3 + $0x4] ss:$12 sps:$4 sm:$0xff]   ;;  %v2432_v47 = vld [vmem:[#allocation3] ss:$12 sps:$4 sm:$0xff]  }
 0x173   :  { %2238 = vmatpush3.bf16.xpose.msra.mxu1 %v2431_v46 }
 0x174   :  { %2243 = vmatprep.subr.bf16.mxu1 %v2809_v1 }
 0x17a   :  { %2240 = vmatmul.mubr.bf16.vlgmr.msra.gmra.mxu1 %v2432_v47 }
 0x17b   :  { %2245 = vmatprep.mubr.msk.bf16.mxu1 %vm2810_vm0, %v2809_v1  ;;  %2244 = vmatpush3.bf16.msra.mxu1 %v2433_v58 }
 0x23a   :  { %v552_v59 = vpop.f32.mrf.mxu1 }
 0x23b   :  { %v560_v60 = vsel %vm559_vm1, %v552_v59, -inf }
 0x23c   :  { %561 = vmax.xlane.f32.xlu0 %v560_v60  ;;  %v2241_v61 = vpop.f32.mrf.mxu1 }
 0x23d   :  { %v2444_v61 = vld [vmem:[#allocation13 + $0xac] ss:$12 sps:$4 sm:$0xff]  }
 0x23e   :  { %v555_v62 = vpop.f32.mrf.mxu1  ;;  %968 = vmatprep.subr.bf16.mxu1 %v2444_v61 }
 0x23f   :  { %v563_v63 = vsel %vm559_vm1, %v555_v62, -inf }
 0x240   :  { %564 = vmax.xlane.f32.xlu0 %v563_v63  ;;  %v2242_v2 = vpop.f32.mrf.mxu1  ;;  %v2445_v63 = vld [vmem:[#allocation13 + $0xb0] ss:$12 sps:$4 sm:$0xff]  }
 0x241   :  { %v2448_v2 = vld [vmem:[#allocation13 + $0x94] ss:$12 sps:$4 sm:$0xff]  }
 0x2c5   :  { %v562_v3 = vpop.xlane.xlu0 %561 }
 0x2c6   :  { %v568_v5 = vsub.f32 %v552_v59, %v562_v3  ;;  %v2446_v3 = vld [vmem:[#allocation13 + $0x90] ss:$12 sps:$4 sm:$0xff]  }
 0x2c9   :  { %v565_v4 = vpop.xlane.xlu0 %564 }
 0x2ca   :  { %v569_v6 = vsub.f32 %v555_v62, %v565_v4  ;;  %v2442_v62 = vld [vmem:[#allocation13 + $0xa8] ss:$12 sps:$4 sm:$0xff]   ;;  %v2449_v4 = vld [vmem:[#allocation13 + $0x98] ss:$12 sps:$4 sm:$0xff]  }
 0x2cc   :  { %v570_v7 = vpack.c.bf16 %v569_v6, %v568_v5  ;;  %v2452_v5 = vld [vmem:[#allocation13 + $0x7c] ss:$12 sps:$4 sm:$0xff]   ;;  %v2450_v6 = vld [vmem:[#allocation13 + $0x78] ss:$12 sps:$4 sm:$0xff]  }
 0x2ce   :  { %v572_v8 = vmul.bf16 1069105081, %v570_v7  ;;  %v2453_v7 = vld [vmem:[#allocation13 + $0x80] ss:$12 sps:$4 sm:$0xff]  }
 0x2d0   :  { %2528 = vpow.bf16 %v572_v8  ;;  %v2456_v8 = vld [vmem:[#allocation13 + $0x64] ss:$12 sps:$4 sm:$0xff]  }
 0x2de   :  { %v2529_v9 = vpop.eup %2528 }
 0x2df   :  { %v2030_v12 = vcombine.low %v2529_v9, %v2529_v9  ;;  %v2031_v13 = vcombine.high %v2529_v9, %v2529_v9  ;;  %v2454_v9 = vld [vmem:[#allocation13 + $0x60] ss:$12 sps:$4 sm:$0xff]  }
 0x2e1   :  { %v581_v14 = vmul.bf16 %v2030_v12, %v566_v10  ;;  %v582_v15 = vmul.bf16 %v2031_v13, %v567_v11  ;;  %v2457_v10 = vld [vmem:[#allocation13 + $0x68] ss:$12 sps:$4 sm:$0xff]   ;;  %v2460_v11 = vld [vmem:[#allocation13 + $0x4c] ss:$12 sps:$4 sm:$0xff]   ;;  %v2461_v13 = vld [vmem:[#allocation13 + $0x50] ss:$12 sps:$4 sm:$0xff]  }
 0x2e2   :  { %v2458_v12 = vld [vmem:[#allocation13 + $0x48] ss:$12 sps:$4 sm:$0xff]  }
 0x2e3   :  { %v2032_v16 = vcombine.low %v581_v14, %v582_v15  ;;  %v2464_v14 = vld [vmem:[#allocation13 + $0x34] ss:$12 sps:$4 sm:$0xff]   ;;  %v2462_v15 = vld [vmem:[#allocation13 + $0x30] ss:$12 sps:$4 sm:$0xff]  }
 0x2e5   :  { %2246 = vmatmul.mubr.msk.bf16.vlgmr.msra.gmra.mxu1 %vm559_vm1, %v2032_v16  ;;  %v2465_v16 = vld [vmem:[#allocation13 + $0x38] ss:$12 sps:$4 sm:$0xff]  }
 0x2e6   :  { %1000 = vmatprep.mubr.bf16.mxu1 %v2808_v0  ;;  %969 = vmatpush1.bf16.msra.mxu1 %v2442_v62 }
 0x2e7   :  { %970 = vmatprep.subr.bf16.mxu1 %v2448_v2 }
 0x2ea   :  { %971 = vmatpush1.bf16.msra.mxu1 %v2446_v3 }
 0x2eb   :  { %972 = vmatprep.subr.bf16.mxu1 %v2452_v5 }
 0x2ee   :  { %973 = vmatpush1.bf16.msra.mxu1 %v2450_v6 }
 0x2ef   :  { %974 = vmatprep.subr.bf16.mxu1 %v2456_v8 }
 0x2f2   :  { %975 = vmatpush1.bf16.msra.mxu1 %v2454_v9 }
 0x2f3   :  { %976 = vmatprep.subr.bf16.mxu1 %v2460_v11 }
 0x2f6   :  { %977 = vmatpush1.bf16.msra.mxu1 %v2458_v12 }
 0x2f7   :  { %978 = vmatprep.subr.bf16.mxu1 %v2464_v14 }
 0x2fa   :  { %979 = vmatpush1.bf16.msra.mxu1 %v2462_v15 }
 0x2fb   :  { %980 = vmatprep.subr.bf16.mxu1 %v2468_v17 }
 0x2fe   :  { %981 = vmatpush1.bf16.msra.mxu1 %v2466_v18 }
 0x2ff   :  { %982 = vmatprep.subr.bf16.mxu1 %v2472_v20 }
 0x302   :  { %983 = vmatpush1.bf16.msra.mxu1 %v2470_v21 }
 0x303   :  { %2289 = vmatprep.subr.bf16.mxu1 %v2809_v1 }
 0x3a5   :  { %v631_v24 = vpop.f32.mrf.mxu1 }
 0x3a6   :  { %v638_v25 = vmax.f32 %v631_v24, 1e-30 }
 0x3a7   :  { %v2247_v26 = vpop.f32.mrf.mxu1 }
 0x3a8   :  { %2530 = vrcp.f32 %v638_v25 }
 0x3a9   :  { %v634_v27 = vpop.f32.mrf.mxu1 }
 0x3aa   :  { %v639_v28 = vmax.f32 %v634_v27, 1e-30 }
 0x3ab   :  { %v2248_v30 = vpop.f32.mrf.mxu1 }
 0x3ac   :  { %2532 = vrcp.f32 %v639_v28 }
 0x3b5   :  { %v2531_v34 = vpop.eup %2530 }
 0x3b6   :  { %644 = vperm.xlu1 %2395, %v2531_v34  }
 0x3b9   :  { %v2533_v36 = vpop.eup %2532 }
 0x3ba   :  { %649 = vperm.xlu1 %2395, %v2533_v36  }
 0x431   :  { %v645_v37 = vpop.permute.xlu1 %644 }
 0x432   :  { %v652_v39 = vmul.f32 %v645_v37, %v631_v24  ;;  %v2045_v37 = vld [vmem:[%s3123_s5 + $0x2] ss:$0 sm:$0xff] }
 0x435   :  { %v650_v38 = vpop.permute.xlu1 %649 }
 0x436   :  { %v653_v40 = vmul.f32 %v650_v38, %v634_v27 }
 0x438   :  { %v654_v41 = vpack.c.bf16 %v653_v40, %v652_v39 }
 0x43a   :  { %2266 = vmatmul.mubr.bf16.vlgmr.msra.gmra.mxu0 %v654_v41 }
 0x43b   :  { %2285 = vmatprep.mubr.msk.bf16.mxu0 %vm2810_vm0, %v2809_v1  ;;  %2270 = vmatpush3.bf16.msra.mxu0 %v2445_v63 }
 0x43c   :  { %2271 = vmatprep.subr.bf16.mxu0 %v2809_v1 }
 0x43f   :  { %2272 = vmatpush3.bf16.msra.mxu0 %v2449_v4 }
 0x440   :  { %2273 = vmatprep.subr.bf16.mxu0 %v2809_v1 }
 0x443   :  { %2274 = vmatpush3.bf16.msra.mxu0 %v2453_v7 }
 0x444   :  { %2275 = vmatprep.subr.bf16.mxu0 %v2809_v1 }
 0x447   :  { %2276 = vmatpush3.bf16.msra.mxu0 %v2457_v10 }
 0x448   :  { %2277 = vmatprep.subr.bf16.mxu0 %v2809_v1 }
 0x44b   :  { %2278 = vmatpush3.bf16.msra.mxu0 %v2461_v13 }
 0x44c   :  { %2279 = vmatprep.subr.bf16.mxu0 %v2809_v1 }
 0x44f   :  { %2280 = vmatpush3.bf16.msra.mxu0 %v2465_v16 }
 0x450   :  { %2281 = vmatprep.subr.bf16.mxu0 %v2809_v1 }
 0x453   :  { %2282 = vmatpush3.bf16.msra.mxu0 %v2469_v19 }
 0x454   :  { %2283 = vmatprep.subr.bf16.mxu0 %v2809_v1 }
 0x457   :  { %2284 = vmatpush3.bf16.msra.mxu0 %v2473_v22  ;;  %v1160_v22 = vld [vmem:[#allocation7] sm:$0xf] }
 0x4fa   :  { %v741_v43 = vpop.f32.mrf.mxu0 }
 0x4fb   :  { %v742_v44 = vadd.f32 %v2035_v42, %v741_v43 }
 0x4fc   :  { %v2267_v45 = vpop.f32.mrf.mxu0 }
 0x4fd   :  { %748 = vadd.xlane.f32.xlu0 %v742_v44  ;;  %v823_v45 = vld [vmem:[#allocation15] sm:$0x7] }
 0x4fe   :  { %v744_v46 = vpop.f32.mrf.mxu0 }
 0x4ff   :  { %v745_v47 = vadd.f32 %v2035_v42, %v744_v46  ;;  %v836_v46 = vrot.slane %v823_v45, %v2970_v48 }
 0x500   :  { %v2268_v49 = vpop.f32.mrf.mxu0 }
 0x501   :  { %750 = vadd.xlane.f32.xlu1 %v745_v47  ;;  %v832_v49 = vrot.slane %v823_v45, %v2963_v32 }
 0x586   :  { %v749_v51 = vpop.xlane.xlu0 %748 }
 0x587   :  { %v752_v52 = vmul.f32 0.0625, %v749_v51 }
 0x589   :  { %v754_v54 = vsub.f32 %v742_v44, %v752_v52 }
 0x58a   :  { %v751_v55 = vpop.xlane.xlu1 %750 }
 0x58b   :  { %v753_v56 = vmul.f32 0.0625, %v751_v55  ;;  %v2998_v57 = vmul.f32 %v2995_v53, %v754_v54 }
 0x58d   :  { %v755_v58 = vsub.f32 %v745_v47, %v753_v56  ;;  %v758_v59 = vmul.f32 %v2998_v57, %v2998_v57  ;;  %v828_v47 = vrot.slane %v823_v45, %v2961_v31 }
 0x58f   :  { %760 = vadd.xlane.f32.xlu0 %v758_v59  ;;  %v3003_v29 = vmul.f32 %v2995_v53, %v755_v58 }
 0x591   :  { %v759_v60 = vmul.f32 %v3003_v29, %v3003_v29 }
 0x593   :  { %762 = vadd.xlane.f32.xlu0 %v759_v60 }
 0x618   :  { %v761_v23 = vpop.xlane.xlu0 %760 }
 0x619   :  { %v764_v24 = vmul.f32 0.0625, %v761_v23  ;;  %v1161_v23 = vld [vmem:[#allocation7 + $0x4] sm:$0xf] }
 0x61b   :  { %v766_v25 = vadd.f32 1e-05, %v764_v24 }
 0x61c   :  { %v763_v26 = vpop.xlane.xlu0 %762 }
 0x61d   :  { %2534 = vrsqrt.f32 %v766_v25  ;;  %v765_v27 = vmul.f32 0.0625, %v763_v26 }
 0x61f   :  { %v767_v28 = vadd.f32 1e-05, %v765_v27 }
 0x621   :  { %2536 = vrsqrt.f32 %v767_v28 }
 0x62a   :  { %v2535_v30 = vpop.eup %2534 }
 0x62b   :  { %v770_v34 = vmul.f32 %v2535_v30, %v2998_v57  ;;  %v2477_v30 = vld [vmem:[#allocation16 + $0x38] sm:$0xff]  }
 0x62d   :  { %v776_v35 = vmul.f32 %v2044_v33, %v770_v34  ;;  %v2479_v34 = vld [vmem:[#allocation16 + $0x28] sm:$0xff]  }
 0x62e   :  { %v2537_v36 = vpop.eup %2536 }
 0x62f   :  { %v771_v38 = vmul.f32 %v2537_v36, %v3003_v29  ;;  %v782_v40 = vadd.f32 %v2045_v37, %v776_v35  ;;  %v2480_v35 = vld [vmem:[#allocation16 + $0x20] sm:$0xff]   ;;  %v2481_v36 = vld [vmem:[#allocation16 + $0x18] sm:$0xff]  }
 0x631   :  { %v777_v39 = vmul.f32 %v2044_v33, %v771_v38  ;;  %v784_v42 = vmax.f32 %v782_v40, 0.0  ;;  %v2478_v33 = vld [vmem:[#allocation16 + $0x30] sm:$0xff]  }
 0x633   :  { %v783_v41 = vadd.f32 %v2045_v37, %v777_v39  ;;  %v2482_v37 = vld [vmem:[#allocation16 + $0x10] sm:$0xff]  }
 0x635   :  { %v785_v43 = vmax.f32 %v783_v41, 0.0 }
 0x637   :  { %v790_v44 = vpack.c.bf16 %v785_v43, %v784_v42 }
 0x639   :  { %1001 = vmatmul.mubr.bf16.vlgmr.msra.gmra.mxu1 %v790_v44  ;;  %2286 = vmatmul.mubr.bf16.vlgmr.msra.gmra.mxu0 %v790_v44  ;;  %v2483_v44 = vld [vmem:[#allocation16 + $0x8] sm:$0xff]  }
 0x63a   :  { %2291 = vmatprep.mubr.msk.bf16.mxu1 %vm2810_vm0, %v2809_v1  ;;  %1594 = vmatprep.mubr.bf16.mxu0 %v2808_v0 }
 0x6f9   :  { %v1002_v51 = vpop.f32.mrf.mxu1  ;;  %v1045_v52 = vpop.f32.mrf.mxu0 }
 0x6fa   :  { %v1046_v54 = vadd.f32 %v1045_v52, %v836_v46  ;;  %v1003_v57 = vadd.f32 %v1002_v51, %v828_v47 }
 0x6fb   :  { %v1004_v55 = vpop.f32.mrf.mxu1  ;;  %v2287_v56 = vpop.f32.mrf.mxu0 }
 0x6fc   :  { %v2144_v58 = vpack.c.bf16 %v1046_v54, %v1046_v54  ;;  %v1005_v59 = vadd.f32 %v1004_v55, %v832_v49  ;;  %v2081_v56 = vld [vmem:[%s3127_s9] ss:$0 sm:$0xff] }
 0x6fd   :  { %v1006_v29 = vpop.f32.mrf.mxu1  ;;  %v1048_v60 = vpop.f32.mrf.mxu0 }
 0x6fe   :  { %1073 = vst [vmem:[#allocation3 + $0x8] sm:$0xf] %v2144_v58  ;;  %v2143_v61 = vpack.c.bf16 %v1005_v59, %v1003_v57  ;;  %v1049_v0 = vadd.f32 %v1048_v60, %v836_v46  ;;  %v1007_v2 = vadd.f32 %v1006_v29, %v828_v47  ;;  %v2484_v46 = vld [vmem:[#allocation16] sm:$0xff]  }
 0x6ff   :  { %v1008_v62 = vpop.f32.mrf.mxu1  ;;  %v2288_v63 = vpop.f32.mrf.mxu0 }
 0x700   :  { %1072 = vst [vmem:[#allocation3] sm:$0xff] %v2143_v61  ;;  %v2146_v3 = vpack.c.bf16 %v1049_v0, %v1049_v0  ;;  %v1009_v4 = vadd.f32 %v1008_v62, %v832_v49 }
 0x702   :  { %1075 = vst [vmem:[#allocation3 + $0x14] sm:$0xf] %v2146_v3  ;;  %v2145_v5 = vpack.c.bf16 %v1009_v4, %v1007_v2 }
 0x704   :  { %1074 = vst [vmem:[#allocation3 + $0xc] sm:$0xff] %v2145_v5 }
 0x709   :  { %v2476_v8 = vld [vmem:[#allocation3 + $0x8] ss:$12 sps:$4 sm:$0xff]  }
 0x70b   :  { %v2474_v6 = vld [vmem:[#allocation3 + $0x4] ss:$12 sps:$4 sm:$0xff]   ;;  %v2475_v7 = vld [vmem:[#allocation3] ss:$12 sps:$4 sm:$0xff]  }
 0x70c   :  { %2290 = vmatpush3.bf16.xpose.msra.mxu1 %v2474_v6 }
 0x70d   :  { %2295 = vmatprep.subr.bf16.mxu1 %v2809_v1 }
 0x713   :  { %2292 = vmatmul.mubr.bf16.vlgmr.msra.gmra.mxu1 %v2475_v7 }
 0x714   :  { %2296 = vmatpush3.bf16.msra.mxu1 %v2476_v8  ;;  %2297 = vmatprep.mubr.msk.bf16.mxu1 %vm2810_vm0, %v2809_v1 }
 0x715   :  { %2301 = vmatprep.subr.bf16.mxu1 %v2809_v1 }
 0x7d3   :  { %v1147_v9 = vpop.f32.mrf.mxu1 }
 0x7d4   :  { %v1154_v10 = vsel %vm559_vm1, %v1147_v9, -inf }
 0x7d5   :  { %1155 = vmax.xlane.f32.xlu0 %v1154_v10  ;;  %v2293_v11 = vpop.f32.mrf.mxu1  ;;  %v2485_v10 = vld [vmem:[#allocation18 + $0xa8] ss:$12 sps:$4 sm:$0xff]  }
 0x7d6   :  { %v2488_v11 = vld [vmem:[#allocation18 + $0xb0] ss:$12 sps:$4 sm:$0xff]  }
 0x7d7   :  { %v1150_v12 = vpop.f32.mrf.mxu1 }
 0x7d8   :  { %v1157_v13 = vsel %vm559_vm1, %v1150_v12, -inf }
 0x7d9   :  { %1158 = vmax.xlane.f32.xlu0 %v1157_v13  ;;  %v2294_v14 = vpop.f32.mrf.mxu1  ;;  %v2489_v13 = vld [vmem:[#allocation18 + $0x90] ss:$12 sps:$4 sm:$0xff]  }
 0x7da   :  { %v2492_v14 = vld [vmem:[#allocation18 + $0x98] ss:$12 sps:$4 sm:$0xff]  }
 0x85e   :  { %v1156_v15 = vpop.xlane.xlu0 %1155 }
 0x85f   :  { %v1162_v17 = vsub.f32 %v1147_v9, %v1156_v15  ;;  %v2487_v9 = vld [vmem:[#allocation18 + $0xac] ss:$12 sps:$4 sm:$0xff]  }
 0x860   :  { %1562 = vmatprep.subr.bf16.mxu0 %v2487_v9  ;;  %v2493_v15 = vld [vmem:[#allocation18 + $0x78] ss:$12 sps:$4 sm:$0xff]  }
 0x861   :  { %1563 = vmatpush1.bf16.msra.mxu0 %v2485_v10 }
 0x862   :  { %v1159_v16 = vpop.xlane.xlu0 %1158 }
 0x863   :  { %v1163_v18 = vsub.f32 %v1150_v12, %v1159_v16  ;;  %v2491_v12 = vld [vmem:[#allocation18 + $0x94] ss:$12 sps:$4 sm:$0xff]  }
 0x864   :  { %1564 = vmatprep.subr.bf16.mxu0 %v2491_v12  ;;  %v2496_v16 = vld [vmem:[#allocation18 + $0x80] ss:$12 sps:$4 sm:$0xff]  }
 0x865   :  { %v1164_v19 = vpack.c.bf16 %v1163_v18, %v1162_v17  ;;  %1565 = vmatpush1.bf16.msra.mxu0 %v2489_v13  ;;  %v2499_v17 = vld [vmem:[#allocation18 + $0x64] ss:$12 sps:$4 sm:$0xff]   ;;  %v2497_v18 = vld [vmem:[#allocation18 + $0x60] ss:$12 sps:$4 sm:$0xff]  }
 0x867   :  { %v1166_v20 = vmul.bf16 1069105081, %v1164_v19  ;;  %v2500_v19 = vld [vmem:[#allocation18 + $0x68] ss:$12 sps:$4 sm:$0xff]  }
 0x869   :  { %2538 = vpow.bf16 %v1166_v20  ;;  %v2503_v20 = vld [vmem:[#allocation18 + $0x4c] ss:$12 sps:$4 sm:$0xff]  }
 0x877   :  { %v2539_v21 = vpop.eup %2538 }
 0x878   :  { %v2076_v24 = vcombine.low %v2539_v21, %v2539_v21  ;;  %v2077_v25 = vcombine.high %v2539_v21, %v2539_v21  ;;  %v2501_v21 = vld [vmem:[#allocation18 + $0x48] ss:$12 sps:$4 sm:$0xff]  }
 0x87a   :  { %v1175_v26 = vmul.bf16 %v2076_v24, %v1160_v22  ;;  %v1176_v27 = vmul.bf16 %v2077_v25, %v1161_v23  ;;  %v2504_v22 = vld [vmem:[#allocation18 + $0x50] ss:$12 sps:$4 sm:$0xff]   ;;  %v2507_v23 = vld [vmem:[#allocation18 + $0x34] ss:$12 sps:$4 sm:$0xff]   ;;  %v2508_v25 = vld [vmem:[#allocation18 + $0x38] ss:$12 sps:$4 sm:$0xff]  }
 0x87b   :  { %v2505_v24 = vld [vmem:[#allocation18 + $0x30] ss:$12 sps:$4 sm:$0xff]  }
 0x87c   :  { %v2078_v28 = vcombine.low %v1175_v26, %v1176_v27  ;;  %v2511_v26 = vld [vmem:[#allocation18 + $0x1c] ss:$12 sps:$4 sm:$0xff]   ;;  %v2509_v27 = vld [vmem:[#allocation18 + $0x18] ss:$12 sps:$4 sm:$0xff]  }
 0x87e   :  { %2298 = vmatmul.mubr.msk.bf16.vlgmr.msra.gmra.mxu1 %vm559_vm1, %v2078_v28  ;;  %v2512_v28 = vld [vmem:[#allocation18 + $0x20] ss:$12 sps:$4 sm:$0xff]  }
 0x87f   :  { %2317 = vmatprep.mubr.msk.bf16.mxu1 %vm2810_vm0, %v2809_v1  ;;  %2302 = vmatpush3.bf16.msra.mxu1 %v2477_v30  ;;  %v2515_v30 = vld [vmem:[#allocation18 + $0x4] ss:$12 sps:$4 sm:$0xff]  }
 0x880   :  { %2303 = vmatprep.subr.bf16.mxu1 %v2809_v1 }
 0x883   :  { %2304 = vmatpush3.bf16.msra.mxu1 %v2478_v33  ;;  %v2513_v33 = vld [vmem:[#allocation18] ss:$12 sps:$4 sm:$0xff]  }
 0x884   :  { %2305 = vmatprep.subr.bf16.mxu1 %v2809_v1 }
 0x887   :  { %2306 = vmatpush3.bf16.msra.mxu1 %v2479_v34  ;;  %v2516_v34 = vld [vmem:[#allocation18 + $0x8] ss:$12 sps:$4 sm:$0xff]  }
 0x888   :  { %2307 = vmatprep.subr.bf16.mxu1 %v2809_v1 }
 0x88b   :  { %2308 = vmatpush3.bf16.msra.mxu1 %v2480_v35 }
 0x88c   :  { %2309 = vmatprep.subr.bf16.mxu1 %v2809_v1 }
 0x88f   :  { %2310 = vmatpush3.bf16.msra.mxu1 %v2481_v36 }
 0x890   :  { %2311 = vmatprep.subr.bf16.mxu1 %v2809_v1 }
 0x893   :  { %2312 = vmatpush3.bf16.msra.mxu1 %v2482_v37 }
 0x894   :  { %2313 = vmatprep.subr.bf16.mxu1 %v2809_v1 }
 0x897   :  { %2314 = vmatpush3.bf16.msra.mxu1 %v2483_v44 }
 0x898   :  { %2315 = vmatprep.subr.bf16.mxu1 %v2809_v1 }
 0x89b   :  { %2316 = vmatpush3.bf16.msra.mxu1 %v2484_v46  ;;  %v2091_v46 = vld [vmem:[%s3127_s9 + $0x2] ss:$0 sm:$0xff] }
 0x89c   :  { %2321 = vmatprep.subr.bf16.mxu1 %v2809_v1 }
 0x93e   :  { %v1225_v38 = vpop.f32.mrf.mxu1 }
 0x93f   :  { %v1232_v39 = vmax.f32 %v1225_v38, 1e-30 }
 0x940   :  { %v2299_v40 = vpop.f32.mrf.mxu1 }
 0x941   :  { %2540 = vrcp.f32 %v1232_v39 }
 0x942   :  { %v1228_v41 = vpop.f32.mrf.mxu1 }
 0x943   :  { %v1233_v42 = vmax.f32 %v1228_v41, 1e-30 }
 0x944   :  { %v2300_v43 = vpop.f32.mrf.mxu1 }
 0x945   :  { %2542 = vrcp.f32 %v1233_v42  ;;  %v2090_v42 = vld [vmem:[%s3127_s9 + $0x1] ss:$0 sm:$0xff] }
 0x94e   :  { %v2541_v45 = vpop.eup %2540 }
 0x94f   :  { %1238 = vperm.xlu0 %2396, %v2541_v45  }
 0x952   :  { %v2543_v47 = vpop.eup %2542 }
 0x953   :  { %1243 = vperm.xlu1 %2395, %v2543_v47  }
 0x9ca   :  { %v1239_v49 = vpop.permute.xlu0 %1238 }
 0x9cb   :  { %v1246_v52 = vmul.f32 %v1239_v49, %v1225_v38 }
 0x9ce   :  { %v1244_v51 = vpop.permute.xlu1 %1243 }
 0x9cf   :  { %v1247_v54 = vmul.f32 %v1244_v51, %v1228_v41 }
 0x9d1   :  { %v1248_v55 = vpack.c.bf16 %v1247_v54, %v1246_v52 }
 0x9d3   :  { %2318 = vmatmul.mubr.bf16.vlgmr.msra.gmra.mxu1 %v1248_v55 }
 0x9d4   :  { %2337 = vmatprep.mubr.msk.bf16.mxu1 %vm2810_vm0, %v2809_v1  ;;  %2322 = vmatpush3.bf16.msra.mxu1 %v2488_v11 }
 0x9d5   :  { %2323 = vmatprep.subr.bf16.mxu1 %v2809_v1 }
 0x9d8   :  { %2324 = vmatpush3.bf16.msra.mxu1 %v2492_v14 }
 0x9d9   :  { %2325 = vmatprep.subr.bf16.mxu1 %v2809_v1 }
 0x9dc   :  { %2326 = vmatpush3.bf16.msra.mxu1 %v2496_v16 }
 0x9dd   :  { %2327 = vmatprep.subr.bf16.mxu1 %v2809_v1 }
 0x9e0   :  { %2328 = vmatpush3.bf16.msra.mxu1 %v2500_v19 }
 0x9e1   :  { %2329 = vmatprep.subr.bf16.mxu1 %v2809_v1 }
 0x9e4   :  { %2330 = vmatpush3.bf16.msra.mxu1 %v2504_v22 }
 0x9e5   :  { %2331 = vmatprep.subr.bf16.mxu1 %v2809_v1 }
 0x9e8   :  { %2332 = vmatpush3.bf16.msra.mxu1 %v2508_v25 }
 0x9e9   :  { %2333 = vmatprep.subr.bf16.mxu1 %v2809_v1 }
 0x9ec   :  { %2334 = vmatpush3.bf16.msra.mxu1 %v2512_v28  ;;  %v1758_v28 = vld [vmem:[#allocation7 + $0x4] sm:$0xf] }
 0x9ed   :  { %2335 = vmatprep.subr.bf16.mxu1 %v2809_v1 }
 0x9f0   :  { %2336 = vmatpush3.bf16.msra.mxu1 %v2516_v34 }
 0x9f1   :  { %2341 = vmatprep.subr.bf16.mxu1 %v2809_v1 }
 0xa93   :  { %v1335_v57 = vpop.f32.mrf.mxu1 }
 0xa94   :  { %v1336_v58 = vadd.f32 %v2081_v56, %v1335_v57  ;;  %v1417_v57 = vld [vmem:[%s3129_s11] sm:$0x7] }
 0xa95   :  { %v2319_v59 = vpop.f32.mrf.mxu1 }
 0xa96   :  { %1342 = vadd.xlane.f32.xlu1 %v1336_v58  ;;  %v1422_v59 = vrot.slane %v1417_v57, %v2961_v31 }
 0xa97   :  { %v1338_v29 = vpop.f32.mrf.mxu1 }
 0xa98   :  { %v1339_v60 = vadd.f32 %v2081_v56, %v1338_v29  ;;  %v1426_v29 = vrot.slane %v1417_v57, %v2963_v32 }
 0xa99   :  { %v2320_v61 = vpop.f32.mrf.mxu1 }
 0xa9a   :  { %1344 = vadd.xlane.f32.xlu0 %v1339_v60 }
 0xb1f   :  { %v1343_v0 = vpop.xlane.xlu1 %1342 }
 0xb20   :  { %v1346_v62 = vmul.f32 0.0625, %v1343_v0 }
 0xb22   :  { %v1348_v63 = vsub.f32 %v1336_v58, %v1346_v62  ;;  %v1430_v58 = vrot.slane %v1417_v57, %v2970_v48 }
 0xb23   :  { %v1345_v2 = vpop.xlane.xlu0 %1344 }
 0xb24   :  { %v1347_v3 = vmul.f32 0.0625, %v1345_v2  ;;  %v3052_v4 = vmul.f32 %v2995_v53, %v1348_v63 }
 0xb26   :  { %v1349_v5 = vsub.f32 %v1339_v60, %v1347_v3  ;;  %v1352_v6 = vmul.f32 %v3052_v4, %v3052_v4 }
 0xb28   :  { %1354 = vadd.xlane.f32.xlu1 %v1352_v6  ;;  %v3057_v7 = vmul.f32 %v2995_v53, %v1349_v5  ;;  %v2495_v53 = vld [vmem:[#allocation18 + $0x7c] ss:$12 sps:$4 sm:$0xff]  }
 0xb29   :  { %1566 = vmatprep.subr.bf16.mxu0 %v2495_v53 }
 0xb2a   :  { %v1353_v8 = vmul.f32 %v3057_v7, %v3057_v7  ;;  %1567 = vmatpush1.bf16.msra.mxu0 %v2493_v15 }
 0xb2b   :  { %1568 = vmatprep.subr.bf16.mxu0 %v2499_v17 }
 0xb2c   :  { %1356 = vadd.xlane.f32.xlu1 %v1353_v8 }
 0xb2e   :  { %1569 = vmatpush1.bf16.msra.mxu0 %v2497_v18 }
 0xb2f   :  { %1570 = vmatprep.subr.bf16.mxu0 %v2503_v20 }
 0xb32   :  { %1571 = vmatpush1.bf16.msra.mxu0 %v2501_v21 }
 0xb33   :  { %1572 = vmatprep.subr.bf16.mxu0 %v2507_v23 }
 0xb36   :  { %1573 = vmatpush1.bf16.msra.mxu0 %v2505_v24 }
 0xb37   :  { %1574 = vmatprep.subr.bf16.mxu0 %v2511_v26 }
 0xb3a   :  { %1575 = vmatpush1.bf16.msra.mxu0 %v2509_v27  ;;  %v1757_v27 = vld [vmem:[#allocation7] sm:$0xf] }
 0xb3b   :  { %1576 = vmatprep.subr.bf16.mxu0 %v2515_v30 }
 0xb3e   :  { %1577 = vmatpush1.bf16.msra.mxu0 %v2513_v33 }
 0xb3f   :  { %2347 = vmatprep.subr.bf16.mxu0 %v2809_v1 }
 0xbb1   :  { %v1355_v35 = vpop.xlane.xlu1 %1354 }
 0xbb2   :  { %v1358_v36 = vmul.f32 0.0625, %v1355_v35 }
 0xbb4   :  { %v1360_v37 = vadd.f32 1e-05, %v1358_v36 }
 0xbb5   :  { %v1357_v38 = vpop.xlane.xlu1 %1356 }
 0xbb6   :  { %2544 = vrsqrt.f32 %v1360_v37  ;;  %v1359_v39 = vmul.f32 0.0625, %v1357_v38  ;;  %v2812_v37 = vmov 8   ;;  %v2520_v38 = vld [vmem:[#allocation19 + $0x38] sm:$0xff]  }
 0xbb7   :  { %2397 = vset.pattern.permute.xlu0 %v2812_v37  ;;  %2398 = vset.pattern.permute.xlu1 %v2812_v37 }
 0xbb8   :  { %v1361_v40 = vadd.f32 1e-05, %v1359_v39  ;;  %v2521_v39 = vld [vmem:[#allocation19 + $0x30] sm:$0xff]  }
 0xbba   :  { %2546 = vrsqrt.f32 %v1361_v40  ;;  %v2522_v40 = vld [vmem:[#allocation19 + $0x28] sm:$0xff]  }
 0xbc3   :  { %v2545_v41 = vpop.eup %2544 }
 0xbc4   :  { %v1364_v43 = vmul.f32 %v2545_v41, %v3052_v4  ;;  %v2523_v41 = vld [vmem:[#allocation19 + $0x20] sm:$0xff]  }
 0xbc6   :  { %v1370_v44 = vmul.f32 %v2090_v42, %v1364_v43  ;;  %v2525_v43 = vld [vmem:[#allocation19 + $0x10] sm:$0xff]  }
 0xbc7   :  { %v2547_v45 = vpop.eup %2546 }
 0xbc8   :  { %v1365_v47 = vmul.f32 %v2547_v45, %v3057_v7  ;;  %v1376_v51 = vadd.f32 %v2091_v46, %v1370_v44 }
 0xbca   :  { %v1371_v49 = vmul.f32 %v2090_v42, %v1365_v47  ;;  %v1378_v54 = vmax.f32 %v1376_v51, 0.0  ;;  %v2524_v42 = vld [vmem:[#allocation19 + $0x18] sm:$0xff]  }
 0xbcc   :  { %v1377_v52 = vadd.f32 %v2091_v46, %v1371_v49 }
 0xbce   :  { %v1379_v55 = vmax.f32 %v1377_v52, 0.0  ;;  %v2526_v52 = vld [vmem:[#allocation19 + $0x8] sm:$0xff]  }
 0xbd0   :  { %v1384_v56 = vpack.c.bf16 %v1379_v55, %v1378_v54  ;;  %v2527_v55 = vld [vmem:[#allocation19] sm:$0xff]  }
 0xbd2   :  { %1595 = vmatmul.mubr.bf16.vlgmr.msra.gmra.mxu0 %v1384_v56  ;;  %2338 = vmatmul.mubr.bf16.vlgmr.msra.gmra.mxu1 %v1384_v56 }
 0xbd3   :  { %2343 = vmatprep.mubr.msk.bf16.mxu1 %vm2810_vm0, %v2809_v1  ;;  %2349 = vmatprep.mubr.msk.bf16.mxu0 %vm2810_vm0, %v2809_v1 }
 0xc92   :  { %v1596_v60 = vpop.f32.mrf.mxu0  ;;  %v1639_v61 = vpop.f32.mrf.mxu1 }
 0xc93   :  { %v1640_v0 = vadd.f32 %v1639_v61, %v1430_v58  ;;  %v1597_v2 = vadd.f32 %v1596_v60, %v1422_v59  ;;  %v2128_v61 = vld [vmem:[%s3131_s13] ss:$0 sm:$0xff] }
 0xc94   :  { %v1598_v62 = vpop.f32.mrf.mxu0  ;;  %v2339_v63 = vpop.f32.mrf.mxu1 }
 0xc95   :  { %v2148_v3 = vpack.c.bf16 %v1640_v0, %v1640_v0  ;;  %v1599_v4 = vadd.f32 %v1598_v62, %v1426_v29 }
 0xc96   :  { %v1600_v5 = vpop.f32.mrf.mxu0  ;;  %v1642_v6 = vpop.f32.mrf.mxu1 }
 0xc97   :  { %1667 = vst [vmem:[#allocation3 + $0x8] sm:$0xf] %v2148_v3  ;;  %v2147_v7 = vpack.c.bf16 %v1599_v4, %v1597_v2  ;;  %v1643_v8 = vadd.f32 %v1642_v6, %v1430_v58  ;;  %v1601_v48 = vadd.f32 %v1600_v5, %v1422_v59 }
 0xc98   :  { %v1602_v9 = vpop.f32.mrf.mxu0  ;;  %v2340_v10 = vpop.f32.mrf.mxu1 }
 0xc99   :  { %1666 = vst [vmem:[#allocation3] sm:$0xff] %v2147_v7  ;;  %v2150_v31 = vpack.c.bf16 %v1643_v8, %v1643_v8  ;;  %v1603_v11 = vadd.f32 %v1602_v9, %v1426_v29  ;;  %v2120_v7 = vsel %vm1693_vm3, 1.0, %v2809_v1 }
 0xc9b   :  { %1669 = vst [vmem:[#allocation3 + $0x14] sm:$0xf] %v2150_v31  ;;  %v2149_v32 = vpack.c.bf16 %v1603_v11, %v1601_v48 }
 0xc9d   :  { %1668 = vst [vmem:[#allocation3 + $0xc] sm:$0xff] %v2149_v32 }
 0xca2   :  { %v2517_v12 = vld [vmem:[#allocation3 + $0x8] ss:$12 sps:$4 sm:$0xff]  }
 0xca3   :  { %2348 = vmatpush3.bf16.msra.mxu0 %v2517_v12 }
 0xca4   :  { %v2518_v13 = vld [vmem:[#allocation3 + $0x4] ss:$12 sps:$4 sm:$0xff]   ;;  %2353 = vmatprep.subr.bf16.mxu0 %v2809_v1  ;;  %v2519_v14 = vld [vmem:[#allocation3] ss:$12 sps:$4 sm:$0xff]  }
 0xca5   :  { %2342 = vmatpush3.bf16.xpose.msra.mxu1 %v2518_v13 }
 0xcac   :  { %2344 = vmatmul.mubr.bf16.vlgmr.msra.gmra.mxu1 %v2519_v14 }
 0xd6c   :  { %v1744_v53 = vpop.f32.mrf.mxu1 }
 0xd6d   :  { %v1751_v15 = vsel %vm559_vm1, %v1744_v53, -inf }
 0xd6e   :  { %1752 = vmax.xlane.f32.xlu0 %v1751_v15  ;;  %v2345_v16 = vpop.f32.mrf.mxu1 }
 0xd70   :  { %v1747_v17 = vpop.f32.mrf.mxu1 }
 0xd71   :  { %v1754_v18 = vsel %vm559_vm1, %v1747_v17, -inf }
 0xd72   :  { %1755 = vmax.xlane.f32.xlu1 %v1754_v18  ;;  %v2346_v19 = vpop.f32.mrf.mxu1 }
 0xd73   :  { %v2138_v19 = vld [vmem:[%s3131_s13 + $0x2] ss:$0 sm:$0xff] }
 0xdf7   :  { %v1753_v20 = vpop.xlane.xlu0 %1752 }
 0xdf8   :  { %v1759_v22 = vsub.f32 %v1744_v53, %v1753_v20 }
 0xdfb   :  { %v1756_v21 = vpop.xlane.xlu1 %1755 }
 0xdfc   :  { %v1760_v23 = vsub.f32 %v1747_v17, %v1756_v21 }
 0xdfe   :  { %v1761_v24 = vpack.c.bf16 %v1760_v23, %v1759_v22 }
 0xe00   :  { %v1763_v25 = vmul.bf16 1069105081, %v1761_v24 }
 0xe02   :  { %2548 = vpow.bf16 %v1763_v25 }
 0xe10   :  { %v2549_v26 = vpop.eup %2548 }
 0xe11   :  { %v2123_v30 = vcombine.low %v2549_v26, %v2549_v26  ;;  %v2124_v33 = vcombine.high %v2549_v26, %v2549_v26 }
 0xe13   :  { %v1772_v34 = vmul.bf16 %v2123_v30, %v1757_v27  ;;  %v1773_v35 = vmul.bf16 %v2124_v33, %v1758_v28 }
 0xe15   :  { %v2125_v36 = vcombine.low %v1772_v34, %v1773_v35 }
 0xe17   :  { %2350 = vmatmul.mubr.msk.bf16.vlgmr.msra.gmra.mxu0 %vm559_vm1, %v2125_v36 }
 0xe18   :  { %2369 = vmatprep.mubr.msk.bf16.mxu0 %vm2810_vm0, %v2809_v1  ;;  %2354 = vmatpush3.bf16.msra.mxu0 %v2520_v38 }
 0xe19   :  { %2355 = vmatprep.subr.bf16.mxu0 %v2809_v1 }
 0xe1c   :  { %2356 = vmatpush3.bf16.msra.mxu0 %v2521_v39 }
 0xe1d   :  { %2357 = vmatprep.subr.bf16.mxu0 %v2809_v1 }
 0xe20   :  { %2358 = vmatpush3.bf16.msra.mxu0 %v2522_v40 }
 0xe21   :  { %2359 = vmatprep.subr.bf16.mxu0 %v2809_v1 }
 0xe24   :  { %2360 = vmatpush3.bf16.msra.mxu0 %v2523_v41 }
 0xe25   :  { %2361 = vmatprep.subr.bf16.mxu0 %v2809_v1 }
 0xe28   :  { %2362 = vmatpush3.bf16.msra.mxu0 %v2524_v42 }
 0xe29   :  { %2363 = vmatprep.subr.bf16.mxu0 %v2809_v1 }
 0xe2c   :  { %2364 = vmatpush3.bf16.msra.mxu0 %v2525_v43 }
 0xe2d   :  { %2365 = vmatprep.subr.bf16.mxu0 %v2809_v1 }
 0xe30   :  { %2366 = vmatpush3.bf16.msra.mxu0 %v2526_v52 }
 0xe31   :  { %2367 = vmatprep.subr.bf16.mxu0 %v2809_v1  ;;  %v2137_v1 = vld [vmem:[%s3131_s13 + $0x1] ss:$0 sm:$0xff] }
 0xe34   :  { %2368 = vmatpush3.bf16.msra.mxu0 %v2527_v55 }
 0xed7   :  { %v1822_v44 = vpop.f32.mrf.mxu0 }
 0xed8   :  { %v1829_v45 = vmax.f32 %v1822_v44, 1e-30 }
 0xed9   :  { %v2351_v46 = vpop.f32.mrf.mxu0 }
 0xeda   :  { %2550 = vrcp.f32 %v1829_v45 }
 0xedb   :  { %v1825_v47 = vpop.f32.mrf.mxu0 }
 0xedc   :  { %v1830_v49 = vmax.f32 %v1825_v47, 1e-30 }
 0xedd   :  { %v2352_v51 = vpop.f32.mrf.mxu0 }
 0xede   :  { %2552 = vrcp.f32 %v1830_v49 }
 0xee7   :  { %v2551_v54 = vpop.eup %2550 }
 0xee8   :  { %1835 = vperm.xlu0 %2397, %v2551_v54  }
 0xeeb   :  { %v2553_v56 = vpop.eup %2552 }
 0xeec   :  { %1840 = vperm.xlu1 %2398, %v2553_v56  }
 0xf63   :  { %v1836_v57 = vpop.permute.xlu0 %1835 }
 0xf64   :  { %v1843_v59 = vmul.f32 %v1836_v57, %v1822_v44 }
 0xf67   :  { %v1841_v58 = vpop.permute.xlu1 %1840 }
 0xf68   :  { %v1844_v29 = vmul.f32 %v1841_v58, %v1825_v47 }
 0xf6a   :  { %v1845_v60 = vpack.c.bf16 %v1844_v29, %v1843_v59 }
 0xf6c   :  { %2370 = vmatmul.mubr.bf16.vlgmr.msra.gmra.mxu0 %v1845_v60 }
0x102c   :  { %v1932_v0 = vpop.f32.mrf.mxu0 }
0x102d   :  { %v1933_v62 = vadd.f32 %v2128_v61, %v1932_v0 }
0x102e   :  { %v2371_v63 = vpop.f32.mrf.mxu0 }
0x102f   :  { %1939 = vadd.xlane.f32.xlu1 %v1933_v62 }
0x1030   :  { %v1935_v2 = vpop.f32.mrf.mxu0 }
0x1031   :  { %v1936_v3 = vadd.f32 %v2128_v61, %v1935_v2 }
0x1032   :  { %v2372_v4 = vpop.f32.mrf.mxu0 }
0x1033   :  { %1941 = vadd.xlane.f32.xlu0 %v1936_v3 }
0x10b8   :  { %v1940_v5 = vpop.xlane.xlu1 %1939 }
0x10b9   :  { %v1943_v6 = vmul.f32 0.125, %v1940_v5 }
0x10bb   :  { %v1945_v8 = vsub.f32 %v1933_v62, %v1943_v6 }
0x10bc   :  { %v1942_v9 = vpop.xlane.xlu0 %1941 }
0x10bd   :  { %v1944_v10 = vmul.f32 0.125, %v1942_v9  ;;  %v1947_v48 = vmul.f32 %v2120_v7, %v1945_v8 }
0x10bf   :  { %v1946_v31 = vsub.f32 %v1936_v3, %v1944_v10  ;;  %v1949_v11 = vmul.f32 %v1947_v48, %v1947_v48 }
0x10c1   :  { %1951 = vadd.xlane.f32.xlu1 %v1949_v11  ;;  %v1948_v32 = vmul.f32 %v2120_v7, %v1946_v31 }
0x10c3   :  { %v1950_v12 = vmul.f32 %v1948_v32, %v1948_v32 }
0x10c5   :  { %1953 = vadd.xlane.f32.xlu1 %v1950_v12 }
0x114a   :  { %v1952_v13 = vpop.xlane.xlu1 %1951 }
0x114b   :  { %v1955_v14 = vmul.f32 0.125, %v1952_v13 }
0x114d   :  { %v1957_v53 = vadd.f32 1e-05, %v1955_v14 }
0x114e   :  { %v1954_v15 = vpop.xlane.xlu1 %1953 }
0x114f   :  { %2554 = vrsqrt.f32 %v1957_v53  ;;  %v1956_v50 = vmul.f32 0.125, %v1954_v15 }
0x1151   :  { %v1958_v16 = vadd.f32 1e-05, %v1956_v50 }
0x1153   :  { %2556 = vrsqrt.f32 %v1958_v16 }
0x115c   :  { %v2555_v17 = vpop.eup %2554 }
0x115d   :  { %v1961_v18 = vmul.f32 %v2555_v17, %v1947_v48 }
0x115f   :  { %v1967_v20 = vmul.f32 %v2137_v1, %v1961_v18 }
0x1160   :  { %v2557_v21 = vpop.eup %2556 }
0x1161   :  { %v1962_v22 = vmul.f32 %v2557_v21, %v1948_v32  ;;  %v1973_v23 = vadd.f32 %v2138_v19, %v1967_v20 }
0x1163   :  { %v1968_v24 = vmul.f32 %v2137_v1, %v1962_v22  ;;  %1975 = vst [vmem:[#allocation21] sm:$0xff] %v1973_v23 }
0x1165   :  { %v1974_v25 = vadd.f32 %v2138_v19, %v1968_v24 }
0x1167   :  { %1976 = vst [vmem:[#allocation21 + $0x8] sm:$0xff] %v1974_v25 }
0x1168   :  { %2769 = shalt.err (!%p2766_p12)
}
0x1169   :  { %1988 = dma.vmem_to_hbm [thread:$0]  %s1983_s1, 256, %s3132_s14, [#allocation6], %s2801_s6, %s2801_s6, %s2802_s25  }
0x116a   :  { %2790 = dma.done.wait [#allocation6], 256  }
0x116b   :  { %2791 = vsyncadd [#allocation6], 4294967040 }
0x116c   :  { %1992 = vsyncpa [#allocation5], 1 }
0x116d   :  { %1993 = vsyncpa [#allocation8], 1 }
0x116e   :  { %1994 = vsyncpa [#allocation11], 1 }
0x116f   :  { %1995 = vsyncpa [#allocation14], 1 }
0x1170   :  { %1996 = vsyncpa [#allocation17], 1 }
0x1171   :  { %1997 = vsyncpa [#allocation20], 1 }
0x1172   :  { %1998 = vsyncpa [#allocation6], 1 }

</bundles_post_ra>
